<compile_context>
chip_gen: v7x
topology: tpu7x:2x2x1
jax: 0.10.0
libtpu: 0.0.40
codegen_flags: <defaults>
</compile_context>

<pallas_src>
import functools

import jax
import jax.numpy as jnp
import numpy as np
from jax.experimental import pallas as pl
from jax.experimental.pallas import tpu as pltpu


# ----------------------------- Pallas kernel ------------------------------ #

def _decoder_kernel(x_ref, w1_ref, b1_ref, w2_ref, b2_ref, g_ref, be_ref,
                    w3_ref, b3_ref, wd1_ref, bd1_ref, wd2_ref, bd2_ref,
                    o_ref, *, eps):
    """Fully fused DecoderCNNSmall forward for one batch element.

    x_ref:   (1, K, D)   latent state per object
    w1/b1:   (D, C), (1, C)      fc1 (weights pre-transposed)
    w2/b2:   (C, C), (1, C)      fc2
    g/be:    (1, C), (1, C)      LayerNorm affine
    w3/b3:   (C, P), (1, P)      fc3, P = map_w * map_h
    wd1/bd1: (C, K), (C, 1)      deconv1 (1x1) in channels-x-pixels layout
    wd2/bd2: (O, C), (O, 1)      deconv2 (10x10, stride 10), O = Cout*10*10
    o_ref:   (1, O, P)
    """
    x = x_ref[0]                                                     # (K, D)

    # fc1 + ReLU
    h = jnp.dot(x, w1_ref[...], preferred_element_type=jnp.float32) + b1_ref[...]
    h = jnp.maximum(h, 0.0)

    # fc2 + LayerNorm + ReLU
    h = jnp.dot(h, w2_ref[...], preferred_element_type=jnp.float32) + b2_ref[...]
    mu = jnp.mean(h, axis=-1, keepdims=True)
    var = jnp.mean(jnp.square(h - mu), axis=-1, keepdims=True)
    h = (h - mu) * jax.lax.rsqrt(var + eps) * g_ref[...] + be_ref[...]
    h = jnp.maximum(h, 0.0)

    # fc3 -> (K, P): rows become the object channels of the deconv input.
    h = jnp.dot(h, w3_ref[...], preferred_element_type=jnp.float32) + b3_ref[...]

    # deconv1 (1x1, stride 1) in channels-x-pixels layout + ReLU -> (C, P)
    a = jnp.dot(wd1_ref[...], h, preferred_element_type=jnp.float32) + bd1_ref[...]
    a = jnp.maximum(a, 0.0)

    # deconv2 (10x10, stride 10): per-pixel matmul -> (Cout*100, P)
    y = jnp.dot(wd2_ref[...], a, preferred_element_type=jnp.float32) + bd2_ref[...]

    o_ref[0] = y.astype(o_ref.dtype)


# ------------------------------- JAX glue --------------------------------- #

def decoder_cnn_small(ins, params, eps=1e-5):
    """ins: (B, num_objects, input_dim) -> (B, out_ch, 10*map_w, 10*map_h)."""
    B, K, D = ins.shape
    C = params["fc1_w"].shape[0]
    out_ch, kH, kW = params["d2_w"].shape[1], params["d2_w"].shape[2], params["d2_w"].shape[3]
    wm, hm = params["map_wh"]
    P = wm * hm
    O = out_ch * kH * kW

    # One-time parameter preparation (weight transposes, bias broadcasting shapes).
    w1 = params["fc1_w"].T                                   # (D, C)
    b1 = params["fc1_b"][None, :]                            # (1, C)
    w2 = params["fc2_w"].T                                   # (C, C)
    b2 = params["fc2_b"][None, :]                            # (1, C)
    g = params["ln_g"][None, :]                              # (1, C)
    be = params["ln_b"][None, :]                             # (1, C)
    w3 = params["fc3_w"].T                                   # (C, P)
    b3 = params["fc3_b"][None, :]                            # (1, P)
    wd1 = params["d1_w"][:, :, 0, 0].T                       # (C, K)
    bd1 = params["d1_b"][:, None]                            # (C, 1)
    wd2 = jnp.transpose(params["d2_w"], (1, 2, 3, 0)).reshape(O, C)   # (O, C)
    bd2 = jnp.repeat(params["d2_b"], kH * kW)[:, None]       # (O, 1)

    def _const_spec(arr):
        return pl.BlockSpec(arr.shape, lambda b: (0, 0))

    out = pl.pallas_call(
        functools.partial(_decoder_kernel, eps=eps),
        out_shape=jax.ShapeDtypeStruct((B, O, P), jnp.float32),
        grid=(B,),
        in_specs=[
            pl.BlockSpec((1, K, D), lambda b: (b, 0, 0)),
            _const_spec(w1), _const_spec(b1),
            _const_spec(w2), _const_spec(b2),
            _const_spec(g), _const_spec(be),
            _const_spec(w3), _const_spec(b3),
            _const_spec(wd1), _const_spec(bd1),
            _const_spec(wd2), _const_spec(bd2),
        ],
        out_specs=pl.BlockSpec((1, O, P), lambda b: (b, 0, 0)),
        compiler_params=pltpu.CompilerParams(dimension_semantics=("parallel",)),
    )(ins, w1, b1, w2, b2, g, be, w3, b3, wd1, bd1, wd2, bd2)

    # Un-block the stride-10 transposed conv: (B, out_ch*kH*kW, wm*hm) -> NCHW.
    out = out.reshape(B, out_ch, kH, kW, wm, hm)
    out = jnp.transpose(out, (0, 1, 4, 2, 5, 3))
    return out.reshape(B, out_ch, wm * kH, hm * kW)


# ------------------------- parameters (synthetic) -------------------------- #

def init_params(key, input_dim, hidden_dim, num_objects, output_size):
    """Deterministic synthetic params matching DecoderCNNSmall.__init__ shapes."""
    out_ch = output_size[0]
    wm, hm = output_size[1] // 10, output_size[2] // 10
    output_dim = wm * hm
    ks = jax.random.split(key, 12)
    s = 0.1
    return {
        "fc1_w": s * jax.random.normal(ks[0], (hidden_dim, input_dim), jnp.float32),
        "fc1_b": s * jax.random.normal(ks[1], (hidden_dim,), jnp.float32),
        "fc2_w": s * jax.random.normal(ks[2], (hidden_dim, hidden_dim), jnp.float32),
        "fc2_b": s * jax.random.normal(ks[3], (hidden_dim,), jnp.float32),
        "ln_g": 1.0 + s * jax.random.normal(ks[4], (hidden_dim,), jnp.float32),
        "ln_b": s * jax.random.normal(ks[5], (hidden_dim,), jnp.float32),
        "fc3_w": s * jax.random.normal(ks[6], (output_dim, hidden_dim), jnp.float32),
        "fc3_b": s * jax.random.normal(ks[7], (output_dim,), jnp.float32),
        "d1_w": s * jax.random.normal(ks[8], (num_objects, hidden_dim, 1, 1), jnp.float32),
        "d1_b": s * jax.random.normal(ks[9], (hidden_dim,), jnp.float32),
        "d2_w": s * jax.random.normal(ks[10], (hidden_dim, out_ch, 10, 10), jnp.float32),
        "d2_b": s * jax.random.normal(ks[11], (out_ch,), jnp.float32),
        "map_wh": (wm, hm),
    }


# ------------------------------- reference --------------------------------- #

def _reference(ins, params, eps=1e-5):
    """Pure-JAX reference mirroring the PyTorch forward (eval mode)."""
    wm, hm = params["map_wh"]
    h = jnp.maximum(ins @ params["fc1_w"].T + params["fc1_b"], 0.0)
    h = h @ params["fc2_w"].T + params["fc2_b"]
    mu = jnp.mean(h, axis=-1, keepdims=True)
    var = jnp.mean(jnp.square(h - mu), axis=-1, keepdims=True)
    h = (h - mu) / jnp.sqrt(var + eps) * params["ln_g"] + params["ln_b"]
    h = jnp.maximum(h, 0.0)
    h = h @ params["fc3_w"].T + params["fc3_b"]                      # (B, K, wm*hm)
    B, K = ins.shape[0], ins.shape[1]
    hc = h.reshape(B, K, wm, hm)
    # ConvTranspose2d(num_objects, hidden, k=1, s=1): plain 1x1 channel mix.
    a = jnp.einsum("bkwh,kc->bcwh", hc, params["d1_w"][:, :, 0, 0])
    a = jnp.maximum(a + params["d1_b"][None, :, None, None], 0.0)
    # ConvTranspose2d(hidden, out_ch, k=10, s=10): non-overlapping 10x10 blocks.
    y = jnp.einsum("bcwh,coij->bowihj", a, params["d2_w"])
    out_ch = params["d2_w"].shape[1]
    y = y.reshape(B, out_ch, wm * 10, hm * 10)
    return y + params["d2_b"][None, :, None, None]


if __name__ == "__main__":
    jax.config.update("jax_default_matmul_precision", "highest")

    key = jax.random.PRNGKey(0)
    key, kx = jax.random.split(key)

    batch, num_objects, input_dim = 2, 5, 4
    hidden_dim = 32
    output_size = (3, 50, 50)          # -> 5x5 latent map, 10x upsampling

    ins = jax.random.normal(kx, (batch, num_objects, input_dim), jnp.float32)
    params = init_params(key, input_dim, hidden_dim, num_objects, output_size)

    out = decoder_cnn_small(ins, params)
    out = jax.block_until_ready(out)
    assert out.shape == (batch, output_size[0], output_size[1], output_size[2])

    ref = _reference(ins, params)
    np.testing.assert_allclose(np.asarray(out), np.asarray(ref),
                               atol=1e-3, rtol=1e-3)
    print("KERNEL_OK")
</pallas_src>

<mosaic_0001>
module attributes {stable_mosaic.version = 11 : i64} {
  func.func @_decoder_kernel(%arg0: i32, %arg1: memref<1x5x4xf32, #tpu.memory_space<vmem>>, %arg2: memref<4x32xf32, #tpu.memory_space<vmem>>, %arg3: memref<1x32xf32, #tpu.memory_space<vmem>>, %arg4: memref<32x32xf32, #tpu.memory_space<vmem>>, %arg5: memref<1x32xf32, #tpu.memory_space<vmem>>, %arg6: memref<1x32xf32, #tpu.memory_space<vmem>>, %arg7: memref<1x32xf32, #tpu.memory_space<vmem>>, %arg8: memref<32x25xf32, #tpu.memory_space<vmem>>, %arg9: memref<1x25xf32, #tpu.memory_space<vmem>>, %arg10: memref<32x5xf32, #tpu.memory_space<vmem>>, %arg11: memref<32x1xf32, #tpu.memory_space<vmem>>, %arg12: memref<300x32xf32, #tpu.memory_space<vmem>>, %arg13: memref<300x1xf32, #tpu.memory_space<vmem>>, %arg14: memref<1x300x25xf32, #tpu.memory_space<vmem>>) attributes {dimension_semantics = [#tpu.dimension_semantics<parallel>], iteration_bounds = array<i64: 2>, scalar_prefetch = 0 : i64, scratch_operands = 0 : i64, tpu.core_type = #tpu.core_type<tc>, window_params = [{transform_indices = @transform_0, window_bounds = array<i64: 1, 5, 4>}, {pipeline_mode = #tpu.pipeline_mode<synchronous>, transform_indices = @transform_1, window_bounds = array<i64: 4, 32>}, {pipeline_mode = #tpu.pipeline_mode<synchronous>, transform_indices = @transform_2, window_bounds = array<i64: 1, 32>}, {pipeline_mode = #tpu.pipeline_mode<synchronous>, transform_indices = @transform_3, window_bounds = array<i64: 32, 32>}, {pipeline_mode = #tpu.pipeline_mode<synchronous>, transform_indices = @transform_4, window_bounds = array<i64: 1, 32>}, {pipeline_mode = #tpu.pipeline_mode<synchronous>, transform_indices = @transform_5, window_bounds = array<i64: 1, 32>}, {pipeline_mode = #tpu.pipeline_mode<synchronous>, transform_indices = @transform_6, window_bounds = array<i64: 1, 32>}, {pipeline_mode = #tpu.pipeline_mode<synchronous>, transform_indices = @transform_7, window_bounds = array<i64: 32, 25>}, {pipeline_mode = #tpu.pipeline_mode<synchronous>, transform_indices = @transform_8, window_bounds = array<i64: 1, 25>}, {pipeline_mode = #tpu.pipeline_mode<synchronous>, transform_indices = @transform_9, window_bounds = array<i64: 32, 5>}, {pipeline_mode = #tpu.pipeline_mode<synchronous>, transform_indices = @transform_10, window_bounds = array<i64: 32, 1>}, {pipeline_mode = #tpu.pipeline_mode<synchronous>, transform_indices = @transform_11, window_bounds = array<i64: 300, 32>}, {pipeline_mode = #tpu.pipeline_mode<synchronous>, transform_indices = @transform_12, window_bounds = array<i64: 300, 1>}, {transform_indices = @transform_13, window_bounds = array<i64: 1, 300, 25>}]} {
    %c0 = arith.constant 0 : index
    %c0_0 = arith.constant 0 : index
    %c0_1 = arith.constant 0 : index
    %0 = vector.load %arg1[%c0, %c0_0, %c0_1] : memref<1x5x4xf32, #tpu.memory_space<vmem>>, vector<1x5x4xf32>
    %1 = vector.shape_cast %0 : vector<1x5x4xf32> to vector<5x4xf32>
    %c0_2 = arith.constant 0 : index
    %c0_3 = arith.constant 0 : index
    %2 = vector.load %arg2[%c0_2, %c0_3] : memref<4x32xf32, #tpu.memory_space<vmem>>, vector<4x32xf32>
    %cst = arith.constant dense<0.000000e+00> : vector<5x32xf32>
    %3 = tpu.matmul %1, %2, %cst {dimension_numbers = #tpu.dot_dimension_numbers<[1], [0], [0], [1], [0, 0, 1, 1], [], []>, precision = #tpu.contract_precision<fp32>} : vector<5x4xf32>, vector<4x32xf32>, vector<5x32xf32> -> vector<5x32xf32>
    %c0_4 = arith.constant 0 : index
    %c0_5 = arith.constant 0 : index
    %4 = vector.load %arg3[%c0_4, %c0_5] : memref<1x32xf32, #tpu.memory_space<vmem>>, vector<1x32xf32>
    %5 = vector.broadcast %4 : vector<1x32xf32> to vector<5x32xf32>
    %6 = arith.addf %3, %5 : vector<5x32xf32>
    %cst_6 = arith.constant 0.000000e+00 : f32
    %7 = vector.broadcast %cst_6 : f32 to vector<5x32xf32>
    %8 = arith.maximumf %6, %7 : vector<5x32xf32>
    %c0_7 = arith.constant 0 : index
    %c0_8 = arith.constant 0 : index
    %9 = vector.load %arg4[%c0_7, %c0_8] : memref<32x32xf32, #tpu.memory_space<vmem>>, vector<32x32xf32>
    %cst_9 = arith.constant dense<0.000000e+00> : vector<5x32xf32>
    %10 = tpu.matmul %8, %9, %cst_9 {dimension_numbers = #tpu.dot_dimension_numbers<[1], [0], [0], [1], [0, 0, 1, 1], [], []>, precision = #tpu.contract_precision<fp32>} : vector<5x32xf32>, vector<32x32xf32>, vector<5x32xf32> -> vector<5x32xf32>
    %c0_10 = arith.constant 0 : index
    %c0_11 = arith.constant 0 : index
    %11 = vector.load %arg5[%c0_10, %c0_11] : memref<1x32xf32, #tpu.memory_space<vmem>>, vector<1x32xf32>
    %12 = vector.broadcast %11 : vector<1x32xf32> to vector<5x32xf32>
    %13 = arith.addf %10, %12 : vector<5x32xf32>
    %cst_12 = arith.constant dense<0.000000e+00> : vector<5xf32>
    %14 = vector.multi_reduction <add>, %13, %cst_12 [1] : vector<5x32xf32> to vector<5xf32>
    %15 = vector.shape_cast %14 : vector<5xf32> to vector<5x1xf32>
    %cst_13 = arith.constant 3.200000e+01 : f32
    %16 = vector.broadcast %cst_13 : f32 to vector<5x1xf32>
    %17 = arith.divf %15, %16 : vector<5x1xf32>
    %18 = vector.broadcast %17 : vector<5x1xf32> to vector<5x32xf32>
    %19 = arith.subf %13, %18 : vector<5x32xf32>
    %20 = arith.mulf %19, %19 : vector<5x32xf32>
    %cst_14 = arith.constant dense<0.000000e+00> : vector<5xf32>
    %21 = vector.multi_reduction <add>, %20, %cst_14 [1] : vector<5x32xf32> to vector<5xf32>
    %22 = vector.shape_cast %21 : vector<5xf32> to vector<5x1xf32>
    %cst_15 = arith.constant 3.200000e+01 : f32
    %23 = vector.broadcast %cst_15 : f32 to vector<5x1xf32>
    %24 = arith.divf %22, %23 : vector<5x1xf32>
    %25 = vector.broadcast %17 : vector<5x1xf32> to vector<5x32xf32>
    %26 = arith.subf %13, %25 : vector<5x32xf32>
    %cst_16 = arith.constant 9.99999974E-6 : f32
    %27 = vector.broadcast %cst_16 : f32 to vector<5x1xf32>
    %28 = arith.addf %24, %27 : vector<5x1xf32>
    %29 = math.rsqrt %28 : vector<5x1xf32>
    %30 = vector.broadcast %29 : vector<5x1xf32> to vector<5x32xf32>
    %31 = arith.mulf %26, %30 : vector<5x32xf32>
    %c0_17 = arith.constant 0 : index
    %c0_18 = arith.constant 0 : index
    %32 = vector.load %arg6[%c0_17, %c0_18] : memref<1x32xf32, #tpu.memory_space<vmem>>, vector<1x32xf32>
    %33 = vector.broadcast %32 : vector<1x32xf32> to vector<5x32xf32>
    %34 = arith.mulf %31, %33 : vector<5x32xf32>
    %c0_19 = arith.constant 0 : index
    %c0_20 = arith.constant 0 : index
    %35 = vector.load %arg7[%c0_19, %c0_20] : memref<1x32xf32, #tpu.memory_space<vmem>>, vector<1x32xf32>
    %36 = vector.broadcast %35 : vector<1x32xf32> to vector<5x32xf32>
    %37 = arith.addf %34, %36 : vector<5x32xf32>
    %cst_21 = arith.constant 0.000000e+00 : f32
    %38 = vector.broadcast %cst_21 : f32 to vector<5x32xf32>
    %39 = arith.maximumf %37, %38 : vector<5x32xf32>
    %c0_22 = arith.constant 0 : index
    %c0_23 = arith.constant 0 : index
    %40 = vector.load %arg8[%c0_22, %c0_23] : memref<32x25xf32, #tpu.memory_space<vmem>>, vector<32x25xf32>
    %cst_24 = arith.constant dense<0.000000e+00> : vector<5x25xf32>
    %41 = tpu.matmul %39, %40, %cst_24 {dimension_numbers = #tpu.dot_dimension_numbers<[1], [0], [0], [1], [0, 0, 1, 1], [], []>, precision = #tpu.contract_precision<fp32>} : vector<5x32xf32>, vector<32x25xf32>, vector<5x25xf32> -> vector<5x25xf32>
    %c0_25 = arith.constant 0 : index
    %c0_26 = arith.constant 0 : index
    %42 = vector.load %arg9[%c0_25, %c0_26] : memref<1x25xf32, #tpu.memory_space<vmem>>, vector<1x25xf32>
    %43 = vector.broadcast %42 : vector<1x25xf32> to vector<5x25xf32>
    %44 = arith.addf %41, %43 : vector<5x25xf32>
    %c0_27 = arith.constant 0 : index
    %c0_28 = arith.constant 0 : index
    %45 = vector.load %arg10[%c0_27, %c0_28] : memref<32x5xf32, #tpu.memory_space<vmem>>, vector<32x5xf32>
    %cst_29 = arith.constant dense<0.000000e+00> : vector<32x25xf32>
    %46 = tpu.matmul %45, %44, %cst_29 {dimension_numbers = #tpu.dot_dimension_numbers<[1], [0], [0], [1], [0, 0, 1, 1], [], []>, precision = #tpu.contract_precision<fp32>} : vector<32x5xf32>, vector<5x25xf32>, vector<32x25xf32> -> vector<32x25xf32>
    %c0_30 = arith.constant 0 : index
    %c0_31 = arith.constant 0 : index
    %47 = vector.load %arg11[%c0_30, %c0_31] : memref<32x1xf32, #tpu.memory_space<vmem>>, vector<32x1xf32>
    %48 = vector.broadcast %47 : vector<32x1xf32> to vector<32x25xf32>
    %49 = arith.addf %46, %48 : vector<32x25xf32>
    %cst_32 = arith.constant 0.000000e+00 : f32
    %50 = vector.broadcast %cst_32 : f32 to vector<32x25xf32>
    %51 = arith.maximumf %49, %50 : vector<32x25xf32>
    %c0_33 = arith.constant 0 : index
    %c0_34 = arith.constant 0 : index
    %52 = vector.load %arg12[%c0_33, %c0_34] : memref<300x32xf32, #tpu.memory_space<vmem>>, vector<300x32xf32>
    %cst_35 = arith.constant dense<0.000000e+00> : vector<300x25xf32>
    %53 = tpu.matmul %52, %51, %cst_35 {dimension_numbers = #tpu.dot_dimension_numbers<[1], [0], [0], [1], [0, 0, 1, 1], [], []>, precision = #tpu.contract_precision<fp32>} : vector<300x32xf32>, vector<32x25xf32>, vector<300x25xf32> -> vector<300x25xf32>
    %c0_36 = arith.constant 0 : index
    %c0_37 = arith.constant 0 : index
    %54 = vector.load %arg13[%c0_36, %c0_37] : memref<300x1xf32, #tpu.memory_space<vmem>>, vector<300x1xf32>
    %55 = vector.broadcast %54 : vector<300x1xf32> to vector<300x25xf32>
    %56 = arith.addf %53, %55 : vector<300x25xf32>
    %c0_38 = arith.constant 0 : index
    %c0_39 = arith.constant 0 : index
    %c0_40 = arith.constant 0 : index
    %57 = vector.load %arg14[%c0_38, %c0_39, %c0_40] : memref<1x300x25xf32, #tpu.memory_space<vmem>>, vector<1x300x25xf32>
    %58 = vector.shape_cast %57 : vector<1x300x25xf32> to vector<300x25xf32>
    %59 = vector.shape_cast %56 : vector<300x25xf32> to vector<1x300x25xf32>
    tpu.vector_store %arg14[%c0_38, %c0_39, %c0_40], %59 {strides = array<i32>} : memref<1x300x25xf32, #tpu.memory_space<vmem>>, vector<1x300x25xf32>,
    return
  }
  func.func @transform_0(%arg0: i32) -> (i32, i32, i32) {
    %c0_i32 = arith.constant 0 : i32
    %c0_i32_0 = arith.constant 0 : i32
    %c0_i32_1 = arith.constant 0 : i32
    return %arg0, %c0_i32, %c0_i32_0 : i32, i32, i32
  }
  func.func @transform_1(%arg0: i32) -> (i32, i32) {
    %c0_i32 = arith.constant 0 : i32
    %c0_i32_0 = arith.constant 0 : i32
    %c0_i32_1 = arith.constant 0 : i32
    return %c0_i32, %c0_i32_0 : i32, i32
  }
  func.func @transform_2(%arg0: i32) -> (i32, i32) {
    %c0_i32 = arith.constant 0 : i32
    %c0_i32_0 = arith.constant 0 : i32
    %c0_i32_1 = arith.constant 0 : i32
    return %c0_i32, %c0_i32_0 : i32, i32
  }
  func.func @transform_3(%arg0: i32) -> (i32, i32) {
    %c0_i32 = arith.constant 0 : i32
    %c0_i32_0 = arith.constant 0 : i32
    %c0_i32_1 = arith.constant 0 : i32
    return %c0_i32, %c0_i32_0 : i32, i32
  }
  func.func @transform_4(%arg0: i32) -> (i32, i32) {
    %c0_i32 = arith.constant 0 : i32
    %c0_i32_0 = arith.constant 0 : i32
    %c0_i32_1 = arith.constant 0 : i32
    return %c0_i32, %c0_i32_0 : i32, i32
  }
  func.func @transform_5(%arg0: i32) -> (i32, i32) {
    %c0_i32 = arith.constant 0 : i32
    %c0_i32_0 = arith.constant 0 : i32
    %c0_i32_1 = arith.constant 0 : i32
    return %c0_i32, %c0_i32_0 : i32, i32
  }
  func.func @transform_6(%arg0: i32) -> (i32, i32) {
    %c0_i32 = arith.constant 0 : i32
    %c0_i32_0 = arith.constant 0 : i32
    %c0_i32_1 = arith.constant 0 : i32
    return %c0_i32, %c0_i32_0 : i32, i32
  }
  func.func @transform_7(%arg0: i32) -> (i32, i32) {
    %c0_i32 = arith.constant 0 : i32
    %c0_i32_0 = arith.constant 0 : i32
    %c0_i32_1 = arith.constant 0 : i32
    return %c0_i32, %c0_i32_0 : i32, i32
  }
  func.func @transform_8(%arg0: i32) -> (i32, i32) {
    %c0_i32 = arith.constant 0 : i32
    %c0_i32_0 = arith.constant 0 : i32
    %c0_i32_1 = arith.constant 0 : i32
    return %c0_i32, %c0_i32_0 : i32, i32
  }
  func.func @transform_9(%arg0: i32) -> (i32, i32) {
    %c0_i32 = arith.constant 0 : i32
    %c0_i32_0 = arith.constant 0 : i32
    %c0_i32_1 = arith.constant 0 : i32
    return %c0_i32, %c0_i32_0 : i32, i32
  }
  func.func @transform_10(%arg0: i32) -> (i32, i32) {
    %c0_i32 = arith.constant 0 : i32
    %c0_i32_0 = arith.constant 0 : i32
    %c0_i32_1 = arith.constant 0 : i32
    return %c0_i32, %c0_i32_0 : i32, i32
  }
  func.func @transform_11(%arg0: i32) -> (i32, i32) {
    %c0_i32 = arith.constant 0 : i32
    %c0_i32_0 = arith.constant 0 : i32
    %c0_i32_1 = arith.constant 0 : i32
    return %c0_i32, %c0_i32_0 : i32, i32
  }
  func.func @transform_12(%arg0: i32) -> (i32, i32) {
    %c0_i32 = arith.constant 0 : i32
    %c0_i32_0 = arith.constant 0 : i32
    %c0_i32_1 = arith.constant 0 : i32
    return %c0_i32, %c0_i32_0 : i32, i32
  }
  func.func @transform_13(%arg0: i32) -> (i32, i32, i32) {
    %c0_i32 = arith.constant 0 : i32
    %c0_i32_0 = arith.constant 0 : i32
    %c0_i32_1 = arith.constant 0 : i32
    return %arg0, %c0_i32, %c0_i32_0 : i32, i32, i32
  }
}

</mosaic_0001>

<bundles_post_ra>
// kernel: tpu_custom_call.1
= control target key start
LH: loop header
LB: loop body
LE: loop exit
PB: predicated region body
PF: predicated region fallthrough
CT: control target
= control target key end

     0   :  { %s6584_s25 = smov 0   ;;  %s7802_s0 = inlined_call_operand.vmem [shape: f32[2,5,4], index: 0, kind: input, shape index: {}]   ;;  %s7803_s1 = inlined_call_operand.vmem [shape: f32[4,32], index: 1, kind: input, shape index: {}]   ;;  %s7804_s2 = inlined_call_operand.vmem [shape: f32[1,32], index: 2, kind: input, shape index: {}]   ;;  %s7805_s3 = inlined_call_operand.vmem [shape: f32[32,32], index: 3, kind: input, shape index: {}]   ;;  %s7806_s4 = inlined_call_operand.vmem [shape: f32[1,32], index: 4, kind: input, shape index: {}]   ;;  %s7807_s5 = inlined_call_operand.vmem [shape: f32[1,32], index: 5, kind: input, shape index: {}]   ;;  %s7808_s6 = inlined_call_operand.vmem [shape: f32[1,32], index: 6, kind: input, shape index: {}]   ;;  %s7809_s7 = inlined_call_operand.vmem [shape: f32[32,25], index: 7, kind: input, shape index: {}]   ;;  %s7810_s8 = inlined_call_operand.vmem [shape: f32[1,25], index: 8, kind: input, shape index: {}]   ;;  %s7811_s9 = inlined_call_operand.vmem [shape: f32[32,5], index: 9, kind: input, shape index: {}]   ;;  %s7812_s10 = inlined_call_operand.vmem [shape: f32[32,1], index: 10, kind: input, shape index: {}]   ;;  %s7813_s11 = inlined_call_operand.vmem [shape: f32[300,32], index: 11, kind: input, shape index: {}]   ;;  %s7814_s12 = inlined_call_operand.vmem [shape: f32[300,1], index: 12, kind: input, shape index: {}]   ;;  %s7815_s13 = inlined_call_operand.vmem [shape: f32[2,300,25], index: 13, kind: output, shape index: {}]  }
   0x1 LB: > { %s5108_s26 = sadd.s32 4294967295, %s6508_s25   ;;  %p5112_p0 = scmp.ge.s32.totalorder %s6508_s25, 1  ;;  %s6508_s25 = sphi %s6584_s25, %s23_s25  }
   0x2   : > { %p386_p1 = scmp.lt.s32.totalorder %s6508_s25, 3 }
   0x4   : > { %p387_p2 = pnand %p5112_p0, %p386_p1 }
   0x6   : > { %390 = sbr.rel (%p387_p2) target bundleno = 1859 (0x743), region = 72 }
   0xd   : > { %v439_v0 = vld [vmem:[%s7803_s1] sm:$0xf]  ;;  %vm451_vm0 = vcmask 1043456   ;;  %p429_p3 = scmp.lt.s32.totalorder %s5108_s26, 1  ;;  %v6510_v1 = vmov 0.0   ;;  %vm6511_vm1 = vmmov 0  }
   0xe   : > { %5476 = vmatprep.subr.mxu0 %v6510_v1  ;;  %v453_v2 = vsel %vm451_vm0, %v439_v0, 0  ;;  %5478 = vmatprep.mubr.msk.f32.mxu0 %vm6511_vm1, %v6510_v1  ;;  %vm447_vm2 = vcmask 31744   ;;  %v902_v15 = vld [vmem:[%s7805_s3] sm:$0xff]  ;;  %v903_v16 = vld [vmem:[%s7805_s3 + $0x8] sm:$0xff]  ;;  %v6512_v22 = vmov 0.0|0.0   ;;  %v904_v23 = vld [vmem:[%s7805_s3 + $0x10] sm:$0xff] }
   0xf   : > { %v456_v3 = vand.u32 4294901760, %v453_v2  ;;  %s7965_s26 = smov (!%p429_p3, %s5108_s26), 1  ;;  %5514 = vmatprep.mubr.msk.f32.mxu1 %vm6511_vm1, %v6510_v1  ;;  %v918_v17 = vand.u32 4294901760, %v902_v15  ;;  %v921_v18 = vand.u32 4294901760, %v903_v16  ;;  %6076 = vmatprep.subr.bf16.mxu1 %v6512_v22  ;;  %v905_v24 = vld [vmem:[%s7805_s3 + $0x18] sm:$0xff]  ;;  %v924_v25 = vand.u32 4294901760, %v904_v23 }
  0x10   : > { %s5113_s29 = sshll.u32 %s7965_s26, 3  ;;  %v927_v26 = vand.u32 4294901760, %v905_v24  ;;  %v5115_v48 = vld [vmem:[%s7804_s2] ss:$0 sm:$0xff]  ;;  %vm913_vm3 = vcmask 261120   ;;  %vm1402_vm4 = vcmask 258048  }
  0x11   : > { %5477 = vmatpush3.msra.mxu0 %v456_v3  ;;  %v533_v4 = vsub.f32 %v453_v2, %v456_v3  ;;  %s432_s15 = scalar_lea.vmem %s7802_s0, %s5113_s29  ;;  %v6629_v19 = vpack.c.bf16 %v921_v18, %v918_v17  ;;  %v998_v20 = vsub.f32 %v902_v15, %v918_v17  ;;  %v1005_v21 = vsub.f32 %v903_v16, %v921_v18  ;;  %v5116_v59 = vld [vmem:[%s7806_s4] ss:$0 sm:$0xff] }
  0x12   : > { %5481 = vmatprep.subr.mxu0 %v6510_v1  ;;  %v438_v5 = vld [vmem:[%s432_s15] sm:$0x1f]  ;;  %v6080_v29 = vpack.c.bf16 %v927_v26, %v924_v25  ;;  %v1012_v30 = vsub.f32 %v904_v23, %v924_v25  ;;  %v1019_v31 = vsub.f32 %v905_v24, %v927_v26  ;;  %vm1961_vm5 = vcmask 39936   ;;  %s6485_s15 = smul.u32 304, %s7965_s26 }
  0x13   : > { %v449_v6 = vsel %vm447_vm2, %v438_v5, 0  ;;  %v534_v7 = vand.u32 4294901760, %v533_v4  ;;  %6078 = vmatpush3.bf16.msra.mxu1 %v6629_v19  ;;  %v999_v27 = vand.u32 4294901760, %v998_v20  ;;  %v1006_v28 = vand.u32 4294901760, %v1005_v21 }
  0x14   : > { %v521_v8 = vand.u32 4294901760, %v449_v6  ;;  %6079 = vmatprep.subr.bf16.mxu1 %v6512_v22  ;;  %v1013_v35 = vand.u32 4294901760, %v1012_v30  ;;  %v1020_v36 = vand.u32 4294901760, %v1019_v31  ;;  %v6089_v44 = vpack.c.bf16 %v1005_v21, %v998_v20  ;;  %s7655_s18 = scalar_lea.vmem %s7815_s13, %s6485_s15 }
  0x15   : > { %v535_v10 = vsub.f32 %v533_v4, %v534_v7  ;;  %v1000_v32 = vsub.f32 %v998_v20, %v999_v27  ;;  %v1007_v33 = vsub.f32 %v1005_v21, %v1006_v28  ;;  %v6092_v45 = vpack.c.bf16 %v1019_v31, %v1012_v30 }
  0x16   : > { %v522_v9 = vsub.f32 %v449_v6, %v521_v8  ;;  %v1014_v38 = vsub.f32 %v1012_v30, %v1013_v35  ;;  %v1021_v39 = vsub.f32 %v1019_v31, %v1020_v36  ;;  %v6101_v46 = vpack.c.bf16 %v1006_v28, %v999_v27  ;;  %v1434_v6 = vld [vmem:[%s7809_s7] sm:$0xff] }
  0x17   : > { %v536_v13 = vand.u32 4294901760, %v535_v10  ;;  %6081 = vmatpush3.bf16.msra.mxu1 %v6080_v29  ;;  %v1001_v34 = vand.u32 4294901760, %v1000_v32  ;;  %v1008_v37 = vand.u32 4294901760, %v1007_v33  ;;  %v6104_v47 = vpack.c.bf16 %v1020_v36, %v1013_v35 }
  0x18   : > { %v523_v11 = vand.u32 4294901760, %v522_v9  ;;  %6082 = vmatprep.subr.bf16.mxu1 %v6512_v22  ;;  %v1015_v41 = vand.u32 4294901760, %v1014_v38  ;;  %v1022_v42 = vand.u32 4294901760, %v1021_v39  ;;  %vm1974_vm6 = vcmask 1044480  }
  0x19   : > { %v6083_v40 = vpack.c.bf16 %v1008_v37, %v1001_v34  ;;  %vm5013_vm7 = vcmask 203776   ;;  %vm5051_vm8 = vcmask 199680  }
  0x1a   : > { %v524_v12 = vsub.f32 %v522_v9, %v523_v11  ;;  %v6086_v43 = vpack.c.bf16 %v1022_v42, %v1015_v41 }
  0x1c   : > { %v525_v14 = vand.u32 4294901760, %v524_v12 }
  0x1e   : > { %5479 = vmatmul.mubr.f32.vlgmr.msra.gmra.mrb[0].mxu0 %v525_v14 }
  0x1f   : > { %5482 = vmatpush3.msra.mxu0 %v536_v13  ;;  %5483 = vmatprep.mubr.msk.f32.mxu0 %vm6511_vm1, %v6510_v1 }
  0x20   : > { %5486 = vmatprep.subr.mxu0 %v6510_v1 }
  0x26   : > { %5484 = vmatmul.mubr.f32.vlgmr.msra.gmra.mrb[0].mxu0 %v521_v8 }
  0x27   : > { %5487 = vmatpush3.msra.mxu0 %v533_v4  ;;  %5488 = vmatprep.mubr.msk.f32.mxu0 %vm6511_vm1, %v6510_v1 }
  0x28   : > { %5491 = vmatprep.subr.mxu0 %v6510_v1 }
  0x2e   : > { %5489 = vmatmul.mubr.f32.vlgmr.msra.gmra.mrb[0].mxu0 %v522_v9  ;;  %v1449_v9 = vand.u32 4294901760, %v1434_v6 }
  0x2f   : > { %5492 = vmatpush3.msra.mxu0 %v456_v3  ;;  %5493 = vmatprep.mubr.msk.f32.mxu0 %vm6511_vm1, %v6510_v1 }
  0x30   : > { %5496 = vmatprep.subr.mxu0 %v6510_v1  ;;  %v1529_v15 = vsub.f32 %v1434_v6, %v1449_v9  ;;  %v1939_v6 = vld [vmem:[%s7812_s10 + $0x10] sm:$0xff] }
  0x32   : > { %v1530_v20 = vand.u32 4294901760, %v1529_v15 }
  0x34   : > { %v1531_v23 = vsub.f32 %v1529_v15, %v1530_v20 }
  0x36   : > { %5494 = vmatmul.mubr.f32.vlgmr.msra.gmra.mrb[0].mxu0 %v523_v11  ;;  %v1437_v11 = vld [vmem:[%s7809_s7 + $0x18] sm:$0xff]  ;;  %v1532_v25 = vand.u32 4294901760, %v1531_v23  ;;  %v2619_v23 = vld [vmem:[%s7814_s12 + $0xc0] sm:$0xff] }
  0x37   : > { %5497 = vmatpush3.msra.mxu0 %v534_v7  ;;  %5498 = vmatprep.mubr.msk.f32.mxu0 %vm6511_vm1, %v6510_v1  ;;  %v1435_v7 = vld [vmem:[%s7809_s7 + $0x8] sm:$0xff]  ;;  %v1458_v13 = vand.u32 4294901760, %v1437_v11 }
  0x38   : > { %5501 = vmatprep.subr.mxu0 %v6510_v1  ;;  %v1452_v10 = vand.u32 4294901760, %v1435_v7 }
  0x39   : > { %v1550_v18 = vsub.f32 %v1437_v11, %v1458_v13  ;;  %v2602_v11 = vld [vmem:[%s7814_s12 + $0x38] sm:$0xff] }
  0x3a   : > { %v6682_v14 = vpack.c.bf16 %v1452_v10, %v1449_v9  ;;  %v1536_v16 = vsub.f32 %v1435_v7, %v1452_v10  ;;  %v2600_v7 = vld [vmem:[%s7814_s12 + $0x28] sm:$0xff]  ;;  %v2601_v9 = vld [vmem:[%s7814_s12 + $0x30] sm:$0xff]  ;;  %v2607_v10 = vld [vmem:[%s7814_s12 + $0x60] sm:$0xff] }
  0x3b   : > { %v1551_v28 = vand.u32 4294901760, %v1550_v18 }
  0x3c   : > { %v1537_v21 = vand.u32 4294901760, %v1536_v16  ;;  %v6125_v35 = vpack.c.bf16 %v1536_v16, %v1529_v15  ;;  %v2604_v15 = vld [vmem:[%s7814_s12 + $0x48] sm:$0xff] }
  0x3d   : > { %v1552_v31 = vsub.f32 %v1550_v18, %v1551_v28 }
  0x3e   : > { %5499 = vmatmul.mubr.f32.vlgmr.msra.gmra.mrb[0].mxu0 %v521_v8  ;;  %v1538_v24 = vsub.f32 %v1536_v16, %v1537_v21  ;;  %v6137_v37 = vpack.c.bf16 %v1537_v21, %v1530_v20  ;;  %v2613_v16 = vld [vmem:[%s7814_s12 + $0x90] sm:$0xff]  ;;  %v2610_v21 = vld [vmem:[%s7814_s12 + $0x78] sm:$0xff] }
  0x3f   : > { %5502 = vmatpush3.msra.mxu0 %v456_v3  ;;  %5503 = vmatprep.mubr.msk.f32.mxu0 %vm6511_vm1, %v6510_v1  ;;  %v1553_v33 = vand.u32 4294901760, %v1552_v31  ;;  %v2617_v20 = vld [vmem:[%s7814_s12 + $0xb0] sm:$0xff]  ;;  %v2627_v31 = vld [vmem:[%s7814_s12 + $0x100] sm:$0xff] }
  0x40   : > { %6112 = vmatprep.subr.bf16.mxu0 %v6512_v22  ;;  %v1539_v26 = vand.u32 4294901760, %v1538_v24  ;;  %v2612_v24 = vld [vmem:[%s7814_s12 + $0x88] sm:$0xff] }
  0x46   : > { %5504 = vmatmul.mubr.f32.vlgmr.msra.gmra.mrb[0].mxu0 %v521_v8  ;;  %v1436_v8 = vld [vmem:[%s7809_s7 + $0x10] sm:$0xff] }
  0x47   : > { %5580 = vmatprep.mubr.msk.f32.mxu0 %vm6511_vm1, %v6510_v1  ;;  %v1455_v12 = vand.u32 4294901760, %v1436_v8  ;;  %6114 = vmatpush3.bf16.msra.mxu0 %v6682_v14 }
  0x48   : > { %6115 = vmatprep.subr.bf16.mxu0 %v6512_v22 }
  0x49   : > { %v1543_v17 = vsub.f32 %v1436_v8, %v1455_v12  ;;  %v2605_v8 = vld [vmem:[%s7814_s12 + $0x50] sm:$0xff] }
  0x4b   : > { %v1544_v27 = vand.u32 4294901760, %v1543_v17  ;;  %v6128_v36 = vpack.c.bf16 %v1550_v18, %v1543_v17  ;;  %v2615_v18 = vld [vmem:[%s7814_s12 + $0xa0] sm:$0xff] }
  0x4d   : > { %v1545_v30 = vsub.f32 %v1543_v17, %v1544_v27  ;;  %v6140_v38 = vpack.c.bf16 %v1551_v28, %v1544_v27  ;;  %v2606_v17 = vld [vmem:[%s7814_s12 + $0x58] sm:$0xff]  ;;  %v2623_v27 = vld [vmem:[%s7814_s12 + $0xe0] sm:$0xff]  ;;  %v2616_v28 = vld [vmem:[%s7814_s12 + $0xa8] sm:$0xff] }
  0x4f   : > { %v1546_v32 = vand.u32 4294901760, %v1545_v30  ;;  %v2618_v30 = vld [vmem:[%s7814_s12 + $0xb8] sm:$0xff] }
  0x51   : > { %v6122_v34 = vpack.c.bf16 %v1553_v33, %v1546_v32  ;;  %v2620_v32 = vld [vmem:[%s7814_s12 + $0xc8] sm:$0xff]  ;;  %v2629_v33 = vld [vmem:[%s7814_s12 + $0x110] sm:$0xff] }
 0x119   : > { %v897_v49 = vpop.f32.mrb[0].mxu0 }
 0x11a   : > { %v6200_v50 = vadd.f32 %v5115_v48, %v897_v49  ;;  %v5505_v51 = vpop.f32.mrb[1].mxu0 }
 0x11c   : > { %v901_v52 = vmax.f32 %v6200_v50, 0.0 }
 0x11e   : > { %v915_v53 = vsel %vm913_vm3, %v901_v52, 0 }
 0x11f   : > { %v986_v54 = vand.u32 4294901760, %v915_v53 }
 0x121   : > { %v987_v55 = vsub.f32 %v915_v53, %v986_v54 }
 0x123   : > { %v988_v56 = vand.u32 4294901760, %v987_v55 }
 0x125   : > { %v989_v57 = vsub.f32 %v987_v55, %v988_v56 }
 0x127   : > { %v990_v58 = vand.u32 4294901760, %v989_v57 }
 0x129   : > { %5515 = vmatmul.mubr.f32.vlgmr.msra.gmra.mrb[0].mxu1 %v990_v58 }
 0x12a   : > { %6084 = vmatpush3.bf16.msra.mxu1 %v6083_v40  ;;  %5525 = vmatprep.mubr.msk.f32.mxu1 %vm6511_vm1, %v6510_v1 }
 0x12b   : > { %6085 = vmatprep.subr.bf16.mxu1 %v6512_v22 }
 0x12e   : > { %6087 = vmatpush3.bf16.msra.mxu1 %v6086_v43  ;;  %v5117_v43 = vld [vmem:[%s7807_s5] ss:$0 sm:$0xff] }
 0x12f   : > { %6088 = vmatprep.subr.bf16.mxu1 %v6512_v22 }
 0x131   : > { %5526 = vmatmul.mubr.f32.vlgmr.msra.gmra.mrb[0].mxu1 %v986_v54 }
 0x132   : > { %6090 = vmatpush3.bf16.msra.mxu1 %v6089_v44  ;;  %5536 = vmatprep.mubr.msk.f32.mxu1 %vm6511_vm1, %v6510_v1 }
 0x133   : > { %6091 = vmatprep.subr.bf16.mxu1 %v6512_v22 }
 0x136   : > { %6093 = vmatpush3.bf16.msra.mxu1 %v6092_v45  ;;  %v5118_v45 = vld [vmem:[%s7808_s6] ss:$0 sm:$0xff] }
 0x137   : > { %6094 = vmatprep.subr.bf16.mxu1 %v6512_v22 }
 0x139   : > { %5537 = vmatmul.mubr.f32.vlgmr.msra.gmra.mrb[0].mxu1 %v987_v55  ;;  %v1933_v55 = vld [vmem:[%s7811_s9] sm:$0xff] }
 0x13a   : > { %6096 = vmatpush3.bf16.msra.mxu1 %v6629_v19  ;;  %5547 = vmatprep.mubr.msk.f32.mxu1 %vm6511_vm1, %v6510_v1 }
 0x13b   : > { %6097 = vmatprep.subr.bf16.mxu1 %v6512_v22 }
 0x13e   : > { %6099 = vmatpush3.bf16.msra.mxu1 %v6080_v29 }
 0x13f   : > { %6100 = vmatprep.subr.bf16.mxu1 %v6512_v22 }
 0x141   : > { %5548 = vmatmul.mubr.f32.vlgmr.msra.gmra.mrb[0].mxu1 %v988_v56  ;;  %v1963_v56 = vsel %vm1961_vm5, %v1933_v55, 0  ;;  %v2632_v55 = vld [vmem:[%s7814_s12 + $0x128] sm:$0xf] }
 0x142   : > { %6102 = vmatpush3.bf16.msra.mxu1 %v6101_v46  ;;  %5558 = vmatprep.mubr.msk.f32.mxu1 %vm6511_vm1, %v6510_v1  ;;  %v6724_v57 = vand.u32 4294901760, %v1963_v56 }
 0x143   : > { %6103 = vmatprep.subr.bf16.mxu1 %v6512_v22 }
 0x144   : > { %v6727_v58 = vsub.f32 %v1963_v56, %v6724_v57 }
 0x146   : > { %6105 = vmatpush3.bf16.msra.mxu1 %v6104_v47 }
 0x147   : > { %6106 = vmatprep.subr.bf16.mxu1 %v6512_v22 }
 0x149   : > { %5559 = vmatmul.mubr.f32.vlgmr.msra.gmra.mrb[0].mxu1 %v986_v54 }
 0x14a   : > { %6108 = vmatpush3.bf16.msra.mxu1 %v6629_v19  ;;  %5569 = vmatprep.mubr.msk.f32.mxu1 %vm6511_vm1, %v6510_v1  ;;  %v6685_v19 = vpack.c.bf16 %v1458_v13, %v1455_v12  ;;  %v2609_v12 = vld [vmem:[%s7814_s12 + $0x70] sm:$0xff]  ;;  %v2603_v13 = vld [vmem:[%s7814_s12 + $0x40] sm:$0xff] }
 0x14b   : > { %6109 = vmatprep.subr.bf16.mxu1 %v6512_v22 }
 0x14c   : > { %6117 = vmatpush3.bf16.msra.mxu0 %v6685_v19 }
 0x14d   : > { %6118 = vmatprep.subr.bf16.mxu0 %v6512_v22 }
 0x14e   : > { %6111 = vmatpush3.bf16.msra.mxu1 %v6080_v29  ;;  %v6119_v29 = vpack.c.bf16 %v1539_v26, %v1532_v25  ;;  %v2621_v25 = vld [vmem:[%s7814_s12 + $0xd0] sm:$0xff]  ;;  %v2614_v26 = vld [vmem:[%s7814_s12 + $0x98] sm:$0xff] }
 0x151   : > { %5570 = vmatmul.mubr.f32.vlgmr.msra.gmra.mrb[0].mxu1 %v986_v54 }
 0x224   : > { %v1398_v60 = vpop.f32.mrb[0].mxu1 }
 0x225   : > { %v6201_v61 = vadd.f32 %v5116_v59, %v1398_v60  ;;  %v5571_v62 = vpop.f32.mrb[1].mxu1  ;;  %v2046_v59 = vand.u32 4294901760, %v6727_v58  ;;  %v6513_v60 = vmov 0  }
 0x226   : > { %6498 = vset.pattern.permute.xlu1 %v6513_v60  ;;  %6499 = vset.pattern.permute.xlu0 %v6513_v60  ;;  %v1938_v62 = vld [vmem:[%s7812_s10 + $0x8] sm:$0xff] }
 0x227   : > { %v1403_v63 = vsel %vm1402_vm4, %v6201_v61, 0.0 }
 0x228   : > { %1404 = vadd.xlane.f32.xlu0 %v1403_v63  ;;  %v1940_v63 = vld [vmem:[%s7812_s10 + $0x18] sm:$0xff] }
 0x2b5   : > { %v1405_v0 = vpop.xlane.xlu0 %1404 }
 0x2b6   : > { %v1407_v2 = vmul.f32 0.03125, %v1405_v0  ;;  %v2595_v0 = vld [vmem:[%s7814_s12] sm:$0xff] }
 0x2b8   : > { %v1408_v3 = vsub.f32 %v6201_v61, %v1407_v2  ;;  %v1937_v61 = vld [vmem:[%s7812_s10] sm:$0xff]  ;;  %v2596_v2 = vld [vmem:[%s7814_s12 + $0x8] sm:$0xff] }
 0x2b9   : > { %1943 = vperm.xlu1 %6498, %v1937_v61  }
 0x2ba   : > { %v1409_v4 = vmul.f32 %v1408_v3, %v1408_v3 }
 0x2bc   : > { %v1410_v5 = vsel %vm1402_vm4, %v1409_v4, 0.0  ;;  %v2598_v4 = vld [vmem:[%s7814_s12 + $0x18] sm:$0xff] }
 0x2bd   : > { %1411 = vadd.xlane.f32.xlu0 %v1410_v5  ;;  %1948 = vperm.xlu1 %6498, %v1938_v62   ;;  %v2599_v5 = vld [vmem:[%s7814_s12 + $0x20] sm:$0xff] }
 0x2c1   : > { %1958 = vperm.xlu1 %6498, %v1940_v63  }
 0x2c5   : > { %2635 = vperm.xlu1 %6498, %v2595_v0  }
 0x2c9   : > { %2640 = vperm.xlu1 %6498, %v2596_v2  }
 0x2d3   : > { %1953 = vperm.xlu0 %6499, %v1939_v6  }
 0x2d7   : > { %2685 = vperm.xlu0 %6499, %v2605_v8  }
 0x2db   : > { %2695 = vperm.xlu0 %6499, %v2607_v10  }
 0x2df   : > { %2705 = vperm.xlu0 %6499, %v2609_v12  }
 0x34a   : > { %v1412_v39 = vpop.xlane.xlu0 %1411 }
 0x34b   : > { %v1413_v40 = vmul.f32 0.03125, %v1412_v39 }
 0x34d   : > { %v1414_v41 = vadd.f32 1e-05, %v1413_v40 }
 0x34f   : > { %6500 = vrsqrt.f32 %v1414_v41  ;;  %v1936_v41 = vld [vmem:[%s7811_s9 + $0x18] sm:$0xff] }
 0x359   : > { %v6501_v42 = vpop.eup %6500 }
 0x35a   : > { %v1416_v44 = vmul.f32 %v6501_v42, %v1408_v3  ;;  %v2597_v3 = vld [vmem:[%s7814_s12 + $0x10] sm:$0xff]  ;;  %v2626_v42 = vld [vmem:[%s7814_s12 + $0xf8] sm:$0xff] }
 0x35b   : > { %2645 = vperm.xlu1 %6498, %v2597_v3  }
 0x35c   : > { %v1424_v46 = vmul.f32 %v5117_v43, %v1416_v44 }
 0x35e   : > { %v1432_v47 = vadd.f32 %v5118_v45, %v1424_v46  ;;  %v1972_v45 = vsel %vm1961_vm5, %v1936_v41, 0  ;;  %v2628_v46 = vld [vmem:[%s7814_s12 + $0x108] sm:$0xff] }
 0x35f   : > { %2650 = vperm.xlu1 %6498, %v2598_v4  }
 0x360   : > { %v1433_v48 = vmax.f32 %v1432_v47, 0.0 }
 0x362   : > { %v1446_v49 = vsel %vm913_vm3, %v1433_v48, 0  ;;  %v2074_v48 = vand.u32 4294901760, %v1972_v45 }
 0x363   : > { %v1517_v50 = vand.u32 4294901760, %v1446_v49  ;;  %2655 = vperm.xlu1 %6498, %v2599_v5  }
 0x365   : > { %v1518_v51 = vsub.f32 %v1446_v49, %v1517_v50 }
 0x367   : > { %v1519_v52 = vand.u32 4294901760, %v1518_v51  ;;  %2660 = vperm.xlu1 %6498, %v2600_v7  }
 0x369   : > { %v1520_v53 = vsub.f32 %v1518_v51, %v1519_v52 }
 0x36b   : > { %v1521_v54 = vand.u32 4294901760, %v1520_v53  ;;  %2665 = vperm.xlu1 %6498, %v2601_v9  }
 0x36d   : > { %5581 = vmatmul.mubr.f32.vlgmr.msra.gmra.mrb[2].mxu0 %v1521_v54  ;;  %v5119_v54 = vld [vmem:[%s7810_s8] ss:$0 sm:$0xff] }
 0x36e   : > { %6120 = vmatpush3.bf16.msra.mxu0 %v6119_v29  ;;  %5591 = vmatprep.mubr.msk.f32.mxu0 %vm6511_vm1, %v6510_v1  ;;  %v2625_v29 = vld [vmem:[%s7814_s12 + $0xf0] sm:$0xff] }
 0x36f   : > { %6121 = vmatprep.subr.bf16.mxu0 %v6512_v22  ;;  %2670 = vperm.xlu1 %6498, %v2602_v11  }
 0x372   : > { %6123 = vmatpush3.bf16.msra.mxu0 %v6122_v34  ;;  %v2622_v34 = vld [vmem:[%s7814_s12 + $0xd8] sm:$0xff] }
 0x373   : > { %6124 = vmatprep.subr.bf16.mxu0 %v6512_v22  ;;  %2675 = vperm.xlu1 %6498, %v2603_v13  }
 0x375   : > { %5592 = vmatmul.mubr.f32.vlgmr.msra.gmra.mrb[2].mxu0 %v1517_v50 }
 0x376   : > { %6126 = vmatpush3.bf16.msra.mxu0 %v6125_v35  ;;  %5602 = vmatprep.mubr.msk.f32.mxu0 %vm6511_vm1, %v6510_v1  ;;  %v2631_v35 = vld [vmem:[%s7814_s12 + $0x120] sm:$0xff] }
 0x377   : > { %6127 = vmatprep.subr.bf16.mxu0 %v6512_v22  ;;  %2680 = vperm.xlu1 %6498, %v2604_v15   ;;  %v2559_v15 = vld [vmem:[%s7813_s11 + $0x10] sm:$0xff] }
 0x37a   : > { %6129 = vmatpush3.bf16.msra.mxu0 %v6128_v36  ;;  %v1934_v36 = vld [vmem:[%s7811_s9 + $0x8] sm:$0xff] }
 0x37b   : > { %6130 = vmatprep.subr.bf16.mxu0 %v6512_v22  ;;  %2690 = vperm.xlu1 %6498, %v2606_v17   ;;  %v1966_v39 = vsel %vm1961_vm5, %v1934_v36, 0 }
 0x37c   : > { %v6861_v43 = vand.u32 4294901760, %v1966_v39 }
 0x37d   : > { %5603 = vmatmul.mubr.f32.vlgmr.msra.gmra.mrb[2].mxu0 %v1518_v51 }
 0x37e   : > { %6132 = vmatpush3.bf16.msra.mxu0 %v6682_v14  ;;  %5613 = vmatprep.mubr.msk.f32.mxu0 %vm6511_vm1, %v6510_v1  ;;  %v2055_v47 = vsub.f32 %v1966_v39, %v6861_v43  ;;  %v2564_v39 = vld [vmem:[%s7813_s11 + $0x38] sm:$0xff] }
 0x37f   : > { %6133 = vmatprep.subr.bf16.mxu0 %v6512_v22 }
 0x380   : > { %v2056_v51 = vand.u32 4294901760, %v2055_v47 }
 0x382   : > { %6135 = vmatpush3.bf16.msra.mxu0 %v6685_v19 }
 0x383   : > { %6136 = vmatprep.subr.bf16.mxu0 %v6512_v22 }
 0x385   : > { %5614 = vmatmul.mubr.f32.vlgmr.msra.gmra.mrb[2].mxu0 %v1519_v52  ;;  %v2075_v52 = vsub.f32 %v1972_v45, %v2074_v48 }
 0x386   : > { %6138 = vmatpush3.bf16.msra.mxu0 %v6137_v37  ;;  %5624 = vmatprep.mubr.msk.f32.mxu0 %vm6511_vm1, %v6510_v1  ;;  %v1935_v37 = vld [vmem:[%s7811_s9 + $0x10] sm:$0xff] }
 0x387   : > { %6139 = vmatprep.subr.bf16.mxu0 %v6512_v22  ;;  %v1969_v40 = vsel %vm1961_vm5, %v1935_v37, 0 }
 0x388   : > { %v6863_v44 = vand.u32 4294901760, %v1969_v40 }
 0x38a   : > { %6141 = vmatpush3.bf16.msra.mxu0 %v6140_v38  ;;  %v2624_v38 = vld [vmem:[%s7814_s12 + $0xe8] sm:$0xff]  ;;  %v2065_v49 = vsub.f32 %v1969_v40, %v6863_v44 }
 0x38b   : > { %6142 = vmatprep.subr.bf16.mxu0 %v6512_v22 }
 0x38c   : > { %v2066_v53 = vand.u32 4294901760, %v2065_v49 }
 0x38d   : > { %5625 = vmatmul.mubr.f32.vlgmr.msra.gmra.mrb[2].mxu0 %v1517_v50 }
 0x38e   : > { %6144 = vmatpush3.bf16.msra.mxu0 %v6682_v14  ;;  %5635 = vmatprep.mubr.msk.f32.mxu0 %vm6511_vm1, %v6510_v1  ;;  %v2047_v1 = vsub.f32 %v6727_v58, %v2046_v59  ;;  %v2611_v14 = vld [vmem:[%s7814_s12 + $0x80] sm:$0xff]  ;;  %v2067_v62 = vsub.f32 %v2065_v49, %v2066_v53 }
 0x38f   : > { %6145 = vmatprep.subr.bf16.mxu0 %v6512_v22  ;;  %2715 = vperm.xlu0 %6499, %v2611_v14   ;;  %v2558_v14 = vld [vmem:[%s7813_s11 + $0x8] sm:$0xff] }
 0x390   : > { %v2048_v22 = vand.u32 4294901760, %v2047_v1  ;;  %v2057_v1 = vsub.f32 %v2055_v47, %v2056_v51  ;;  %v2068_v4 = vand.u32 4294901760, %v2067_v62  ;;  %v2827_v17 = vsel %vm913_vm3, %v2558_v14, 0 }
 0x392   : > { %6147 = vmatpush3.bf16.msra.mxu0 %v6685_v19  ;;  %5640 = vmatprep.mubr.f32.mxu1 %v2048_v22  ;;  %v2608_v19 = vld [vmem:[%s7814_s12 + $0x68] sm:$0xff]  ;;  %v2076_v22 = vand.u32 4294901760, %v2075_v52  ;;  %v2058_v2 = vand.u32 4294901760, %v2057_v1 }
 0x393   : > { %2725 = vperm.xlu0 %6499, %v2613_v16   ;;  %2700 = vperm.xlu1 %6498, %v2608_v19   ;;  %v2560_v16 = vld [vmem:[%s7813_s11 + $0x18] sm:$0xff] }
 0x394   : > { %v2077_v3 = vsub.f32 %v2075_v52, %v2076_v22  ;;  %v2833_v19 = vsel %vm913_vm3, %v2560_v16, 0 }
 0x395   : > { %5636 = vmatmul.mubr.f32.vlgmr.msra.gmra.mrb[2].mxu0 %v1517_v50  ;;  %v2630_v50 = vld [vmem:[%s7814_s12 + $0x118] sm:$0xff] }
 0x396   : > { %v2078_v6 = vand.u32 4294901760, %v2077_v3  ;;  %v2566_v3 = vld [vmem:[%s7813_s11 + $0x48] sm:$0xff] }
 0x397   : > { %2735 = vperm.xlu0 %6499, %v2615_v18   ;;  %2710 = vperm.xlu1 %6498, %v2610_v21   ;;  %v2830_v18 = vsel %vm913_vm3, %v2559_v15, 0  ;;  %v2851_v16 = vsel %vm913_vm3, %v2566_v3, 0 }
 0x398   : > { %v6920_v21 = vand.u32 4294901760, %v2830_v18 }
 0x39b   : > { %2745 = vperm.xlu0 %6499, %v2617_v20   ;;  %2720 = vperm.xlu1 %6498, %v2612_v24   ;;  %v6918_v20 = vand.u32 4294901760, %v2827_v17  ;;  %v2561_v24 = vld [vmem:[%s7813_s11 + $0x20] sm:$0xff] }
 0x39f   : > { %2755 = vperm.xlu0 %6499, %v2619_v23   ;;  %2730 = vperm.xlu1 %6498, %v2614_v26   ;;  %v6922_v23 = vand.u32 4294901760, %v2833_v19  ;;  %v6928_v26 = vsub.f32 %v2827_v17, %v6918_v20 }
 0x3a3   : > { %2765 = vperm.xlu0 %6499, %v2621_v25   ;;  %2740 = vperm.xlu1 %6498, %v2616_v28   ;;  %v1944_v25 = vpop.permute.xlu1 %1943  ;;  %v2562_v28 = vld [vmem:[%s7813_s11 + $0x28] sm:$0xff] }
 0x3a7   : > { %2775 = vperm.xlu0 %6499, %v2623_v27   ;;  %2750 = vperm.xlu1 %6498, %v2618_v30   ;;  %v6931_v27 = vsub.f32 %v2830_v18, %v6920_v21  ;;  %v2836_v30 = vsel %vm913_vm3, %v2561_v24, 0  ;;  %v1949_v36 = vpop.permute.xlu1 %1948 }
 0x3ab   : > { %2785 = vperm.xlu0 %6499, %v2625_v29   ;;  %2760 = vperm.xlu1 %6498, %v2620_v32   ;;  %v6937_v29 = vsub.f32 %v2833_v19, %v6922_v23  ;;  %v3028_v32 = vand.u32 4294901760, %v6931_v27 }
 0x3ad   : > { %v3038_v37 = vand.u32 4294901760, %v6937_v29 }
 0x3af   : > { %2795 = vperm.xlu0 %6499, %v2627_v31   ;;  %2770 = vperm.xlu1 %6498, %v2622_v34   ;;  %v3018_v31 = vand.u32 4294901760, %v6928_v26  ;;  %v6943_v34 = vand.u32 4294901760, %v2836_v30 }
 0x3b1   : > { %v6957_v41 = vsub.f32 %v6928_v26, %v3018_v31 }
 0x3b3   : > { %2805 = vperm.xlu0 %6499, %v2629_v33   ;;  %2780 = vperm.xlu1 %6498, %v2624_v38   ;;  %v2839_v33 = vsel %vm913_vm3, %v2562_v28, 0  ;;  %v3020_v1 = vand.u32 4294901760, %v6957_v41 }
 0x3b4   : > { %v6949_v38 = vand.u32 4294901760, %v2839_v33 }
 0x3b7   : > { %2815 = vperm.xlu0 %6499, %v2631_v35   ;;  %2790 = vperm.xlu1 %6498, %v2626_v42   ;;  %v2563_v35 = vld [vmem:[%s7813_s11 + $0x30] sm:$0xff]  ;;  %v6962_v42 = vsub.f32 %v6931_v27, %v3028_v32 }
 0x3bb   : > { %2800 = vperm.xlu1 %6498, %v2628_v46   ;;  %v6966_v46 = vsub.f32 %v2836_v30, %v6943_v34 }
 0x3bf   : > { %2810 = vperm.xlu1 %6498, %v2630_v50  }
 0x3c3   : > { %2820 = vperm.xlu1 %6498, %v2632_v55  }
 0x468   : > { %v1929_v56 = vpop.f32.mrb[2].mxu0 }
 0x469   : > { %v6202_v60 = vadd.f32 %v5119_v54, %v1929_v56  ;;  %v5637_v61 = vpop.f32.mrb[3].mxu0  ;;  %v1959_v54 = vpop.permute.xlu1 %1958 }
 0x46b   : > { %v1976_v63 = vsel %vm1974_vm6, %v6202_v60, 0  ;;  %v1954_v60 = vpop.permute.xlu0 %1953 }
 0x46c   : > { %v1979_v0 = vand.u32 4294901760, %v1976_v63 }
 0x46e   : > { %v2086_v5 = vsub.f32 %v1976_v63, %v1979_v0  ;;  %5638 = vmatprep.subr.mxu1 %v1979_v0 }
 0x46f   : > { %5639 = vmatpush3.msra.mxu1 %v1979_v0 }
 0x470   : > { %5641 = vmatmul.mubr.f32.vlgmr.msra.gmra.mrb[2].mxu1 %v2058_v2  ;;  %v2087_v7 = vand.u32 4294901760, %v2086_v5 }
 0x471   : > { %5643 = vmatprep.mubr.f32.mxu1 %v2068_v4 }
 0x472   : > { %v2088_v8 = vsub.f32 %v2086_v5, %v2087_v7 }
 0x474   : > { %5644 = vmatmul.mubr.f32.gmra.mrb[4].mxu1 %v2078_v6  ;;  %v2089_v9 = vand.u32 4294901760, %v2088_v8 }
 0x475   : > { %5648 = vmatprep.mubr.f32.mxu1 %v6724_v57 }
 0x476   : > { %5646 = vmatprep.subr.mxu1 %v2089_v9 }
 0x477   : > { %5647 = vmatpush3.msra.mxu1 %v2089_v9 }
 0x478   : > { %5649 = vmatmul.mubr.f32.vlgmr.msra.gmra.mrb[2].mxu1 %v6861_v43  ;;  %5654 = vmatprep.subr.mxu1 %v2086_v5 }
 0x479   : > { %5655 = vmatpush3.msra.mxu1 %v2086_v5  ;;  %5651 = vmatprep.mubr.f32.mxu1 %v6863_v44 }
 0x47a   : > { %5662 = vmatprep.subr.mxu1 %v1979_v0 }
 0x47c   : > { %5652 = vmatmul.mubr.f32.gmra.mrb[4].mxu1 %v2074_v48 }
 0x47d   : > { %5656 = vmatprep.mubr.f32.mxu1 %v6727_v58  ;;  %v2557_v58 = vld [vmem:[%s7813_s11] sm:$0xff] }
 0x480   : > { %5657 = vmatmul.mubr.f32.vlgmr.msra.gmra.mrb[2].mxu1 %v2055_v47 }
 0x481   : > { %5663 = vmatpush3.msra.mxu1 %v1979_v0  ;;  %5659 = vmatprep.mubr.f32.mxu1 %v2065_v49  ;;  %v2845_v49 = vsel %vm913_vm3, %v2564_v39, 0 }
 0x482   : > { %5670 = vmatprep.subr.mxu1 %v2087_v7  ;;  %v6985_v2 = vand.u32 4294901760, %v2845_v49 }
 0x484   : > { %5660 = vmatmul.mubr.f32.gmra.mrb[4].mxu1 %v2075_v52  ;;  %v7003_v19 = vsub.f32 %v2845_v49, %v6985_v2 }
 0x485   : > { %5664 = vmatprep.mubr.f32.mxu1 %v2046_v59  ;;  %v2824_v59 = vsel %vm913_vm3, %v2557_v58, 0 }
 0x486   : > { %v6896_v10 = vand.u32 4294901760, %v2824_v59  ;;  %7875 = vst [vmem:[#allocation3_spill] sm:$0xff] %v7003_v19 }
 0x488   : > { %5665 = vmatmul.mubr.f32.vlgmr.msra.gmra.mrb[2].mxu1 %v2056_v51  ;;  %v6899_v11 = vsub.f32 %v2824_v59, %v6896_v10  ;;  %v6975_v51 = vsub.f32 %v2839_v33, %v6949_v38 }
 0x489   : > { %5671 = vmatpush3.msra.mxu1 %v2087_v7  ;;  %5667 = vmatprep.mubr.f32.mxu1 %v2066_v53  ;;  %v2565_v53 = vld [vmem:[%s7813_s11 + $0x40] sm:$0xff] }
 0x48a   : > { %5678 = vmatprep.subr.mxu1 %v1979_v0  ;;  %v3008_v12 = vand.u32 4294901760, %v6899_v11  ;;  %5824 = vmatprep.mubr.f32.mxu0 %v6899_v11  ;;  %v2848_v7 = vsel %vm913_vm3, %v2565_v53, 0  ;;  %v3058_v58 = vand.u32 4294901760, %v6975_v51 }
 0x48b   : > { %v7005_v24 = vand.u32 4294901760, %v2848_v7 }
 0x48c   : > { %5668 = vmatmul.mubr.f32.gmra.mrb[4].mxu1 %v2076_v22  ;;  %v3030_v22 = vand.u32 4294901760, %v6962_v42 }
 0x48d   : > { %5672 = vmatprep.mubr.f32.mxu1 %v6724_v57 }
 0x490   : > { %5673 = vmatmul.mubr.f32.vlgmr.msra.gmra.mrb[2].mxu1 %v6861_v43 }
 0x491   : > { %5679 = vmatpush3.msra.mxu1 %v1979_v0  ;;  %5675 = vmatprep.mubr.f32.mxu1 %v6863_v44  ;;  %v3048_v0 = vand.u32 4294901760, %v6966_v46 }
 0x494   : > { %5676 = vmatmul.mubr.f32.gmra.mrb[4].mxu1 %v2074_v48 }
 0x495   : > { %5680 = vmatprep.mubr.f32.mxu1 %v6724_v57  ;;  %v3009_v57 = vsub.f32 %v6899_v11, %v3008_v12 }
 0x497   : > { %v3010_v13 = vand.u32 4294901760, %v3009_v57  ;;  %v2567_v57 = vld [vmem:[%s7813_s11 + $0x50] sm:$0xff] }
 0x498   : > { %5681 = vmatmul.mubr.f32.vlgmr.msra.gmra.mrb[2].mxu1 %v6861_v43  ;;  %v2842_v43 = vsel %vm913_vm3, %v2563_v35, 0  ;;  %v2854_v33 = vsel %vm913_vm3, %v2567_v57, 0 }
 0x499   : > { %5683 = vmatprep.mubr.f32.mxu1 %v6863_v44  ;;  %v6977_v52 = vand.u32 4294901760, %v2842_v43 }
 0x49b   : > { %v6994_v59 = vsub.f32 %v2842_v43, %v6977_v52  ;;  %v2568_v43 = vld [vmem:[%s7813_s11 + $0x58] sm:$0xff] }
 0x49c   : > { %5684 = vmatmul.mubr.f32.gmra.mrb[4].mxu1 %v2074_v48  ;;  %v6971_v48 = vsub.f32 %v6937_v29, %v3038_v37 }
 0x49d   : > { %5694 = vmatprep.mubr.f32.mxu1 %v3010_v13  ;;  %7874 = vst [vmem:[#allocation2_spill] sm:$0xff] %v6994_v59  ;;  %v7821_v39 = vand.u32 4294901760, %v6994_v59 }
 0x49e   : > { %v3040_v6 = vand.u32 4294901760, %v6971_v48 }
 0x56b   : > { %v5682_v40 = vpop.f32.mrb[2].mxu1 }
 0x56c   : > { %v6203_v44 = vadd.f32 %v5682_v40, %v1949_v36  ;;  %v2531_v45 = vpop.f32.mrb[3].mxu1  ;;  %v7013_v40 = vand.u32 4294901760, %v2851_v16 }
 0x56d   : > { %v6204_v47 = vadd.f32 %v2531_v45, %v1944_v25 }
 0x56e   : > { %v2554_v50 = vmax.f32 %v6203_v44, 0.0 }
 0x56f   : > { %v2553_v55 = vmax.f32 %v6204_v47, 0.0  ;;  %v5685_v56 = vpop.f32.mrb[4].mxu1 }
 0x570   : > { %v2941_v61 = vand.u32 4294901760, %v2554_v50  ;;  %v6205_v62 = vadd.f32 %v5685_v56, %v1959_v54  ;;  %v2543_v63 = vpop.f32.mrb[5].mxu1  ;;  %v7025_v54 = vsub.f32 %v2848_v7, %v7005_v24  ;;  %v2569_v56 = vld [vmem:[%s7813_s11 + $0x60] sm:$0xff]  ;;  %v7819_v7 = vand.u32 4294901760, %v7003_v19 }
 0x571   : > { %v2938_v4 = vand.u32 4294901760, %v2553_v55  ;;  %v6206_v5 = vadd.f32 %v2543_v63, %v1954_v60  ;;  %v2857_v63 = vsel %vm913_vm3, %v2568_v43, 0 }
 0x572   : > { %v3395_v8 = vsub.f32 %v2554_v50, %v2941_v61  ;;  %v2556_v9 = vmax.f32 %v6205_v62, 0.0  ;;  %7876 = vst [vmem:[#allocation4_spill] sm:$0xff] %v7025_v54  ;;  %v7818_v43 = vand.u32 4294901760, %v7025_v54 }
 0x573   : > { %v6999_v13 = vpack.c.bf16 %v2941_v61, %v2938_v4  ;;  %v3388_v14 = vsub.f32 %v2553_v55, %v2938_v4  ;;  %v2555_v15 = vmax.f32 %v6206_v5, 0.0  ;;  %v7027_v55 = vand.u32 4294901760, %v2854_v33 }
 0x574   : > { %v3396_v17 = vand.u32 4294901760, %v3395_v8  ;;  %v2947_v18 = vand.u32 4294901760, %v2556_v9  ;;  %v3049_v4 = vsub.f32 %v6966_v46, %v3048_v0  ;;  %v3059_v5 = vsub.f32 %v6975_v51, %v3058_v58 }
 0x575   : > { %v3389_v25 = vand.u32 4294901760, %v3388_v14  ;;  %v2944_v28 = vand.u32 4294901760, %v2555_v15  ;;  %6149 = vmatprep.subr.bf16.mxu1 %v6999_v13  ;;  %v7008_v30 = vpack.c.bf16 %v3395_v8, %v3388_v14 }
 0x576   : > { %v3409_v35 = vsub.f32 %v2556_v9, %v2947_v18  ;;  %6151 = vmatpush3.bf16.msra.mxu1 %v6999_v13  ;;  %v3397_v36 = vsub.f32 %v3395_v8, %v3396_v17  ;;  %v2570_v8 = vld [vmem:[%s7813_s11 + $0x68] sm:$0xff] }
 0x577   : > { %v7018_v44 = vpack.c.bf16 %v2947_v18, %v2944_v28  ;;  %v3402_v45 = vsub.f32 %v2555_v15, %v2944_v28  ;;  %6165 = vmatprep.subr.bf16.mxu0 %v7008_v30  ;;  %v3390_v47 = vsub.f32 %v3388_v14, %v3389_v25  ;;  %v7021_v49 = vpack.c.bf16 %v3396_v17, %v3389_v25 }
 0x578   : > { %v3410_v50 = vand.u32 4294901760, %v3409_v35  ;;  %6167 = vmatpush3.bf16.msra.mxu0 %v7008_v30  ;;  %v3398_v53 = vand.u32 4294901760, %v3397_v36  ;;  %v2860_v15 = vsel %vm913_vm3, %v2569_v56, 0  ;;  %v3069_v18 = vsub.f32 %v6994_v59, %v7821_v39 }
 0x579   : > { %v3403_v60 = vand.u32 4294901760, %v3402_v45  ;;  %6153 = vmatprep.subr.bf16.mxu1 %v7018_v44  ;;  %v7033_v61 = vpack.c.bf16 %v3409_v35, %v3402_v45  ;;  %v3391_v62 = vand.u32 4294901760, %v3390_v47  ;;  %v7056_v25 = vsub.f32 %v2851_v16, %v7013_v40 }
 0x57a   : > { %6155 = vmatpush3.bf16.msra.mxu1 %v7018_v44  ;;  %v3411_v3 = vsub.f32 %v3409_v35, %v3410_v50  ;;  %v7058_v28 = vand.u32 4294901760, %v2857_v63  ;;  %v2571_v35 = vld [vmem:[%s7813_s11 + $0x70] sm:$0xff]  ;;  %v2863_v47 = vsel %vm913_vm3, %v2570_v8, 0  ;;  %v7071_v16 = vand.u32 4294901760, %v2860_v15 }
 0x57b   : > { %6169 = vmatprep.subr.bf16.mxu0 %v7033_v61  ;;  %v6156_v9 = vpack.c.bf16 %v3398_v53, %v3391_v62  ;;  %v3404_v57 = vsub.f32 %v3402_v45, %v3403_v60  ;;  %v7048_v14 = vpack.c.bf16 %v3410_v50, %v3403_v60  ;;  %7877 = vst [vmem:[#allocation5_spill] sm:$0xff] %v7056_v25  ;;  %v2866_v50 = vsel %vm913_vm3, %v2571_v35, 0  ;;  %v2573_v53 = vld [vmem:[%s7813_s11 + $0x80] sm:$0xff] }
 0x57c   : > { %6171 = vmatpush3.bf16.msra.mxu0 %v7033_v61  ;;  %v3412_v17 = vand.u32 4294901760, %v3411_v3  ;;  %v7067_v45 = vsub.f32 %v2854_v33, %v7027_v55  ;;  %v2572_v33 = vld [vmem:[%s7813_s11 + $0x78] sm:$0xff]  ;;  %v3060_v56 = vand.u32 4294901760, %v3059_v5  ;;  %v7817_v42 = vand.u32 4294901760, %v7056_v25 }
 0x57d   : > { %5695 = vmatmul.mubr.f32.vlgmr.msra.gmra.mrb[6].mxu1 %v3020_v1  ;;  %6157 = vmatprep.subr.bf16.mxu1 %v6156_v9  ;;  %v3405_v36 = vand.u32 4294901760, %v3404_v57  ;;  %v3050_v1 = vand.u32 4294901760, %v3049_v4  ;;  %v7089_v60 = vand.u32 4294901760, %v2863_v47  ;;  %v3070_v62 = vand.u32 4294901760, %v3069_v18  ;;  %v2575_v18 = vld [vmem:[%s7813_s11 + $0x90] sm:$0xff] }
 0x57e   : > { %7878 = vst [vmem:[#allocation6_spill] sm:$0xff] %v7067_v45  ;;  %6173 = vmatprep.subr.bf16.mxu0 %v6999_v13  ;;  %6159 = vmatpush3.bf16.msra.mxu1 %v6156_v9  ;;  %v3079_v3 = vsub.f32 %v7003_v19, %v7819_v7  ;;  %v3089_v4 = vsub.f32 %v7025_v54, %v7818_v43  ;;  %v7816_v5 = vand.u32 4294901760, %v7067_v45  ;;  %v7104_v48 = vand.u32 4294901760, %v2866_v50  ;;  %v2574_v9 = vld [vmem:[%s7813_s11 + $0x88] sm:$0xff] }
 0x57f   : > { %5825 = vmatmul.mubr.f32.vlgmr.msra.gmra.mrb[4].mxu0 %v6928_v26  ;;  %5697 = vmatprep.mubr.f32.mxu1 %v3030_v22  ;;  %v6160_v41 = vpack.c.bf16 %v3412_v17, %v3405_v36  ;;  %v7087_v22 = vsub.f32 %v2857_v63, %v7058_v28  ;;  %v7102_v63 = vsub.f32 %v2860_v15, %v7071_v16  ;;  %v2872_v8 = vsel %vm913_vm3, %v2573_v53, 0 }
 0x580   : > { %6175 = vmatpush3.bf16.msra.mxu0 %v6999_v13  ;;  %5827 = vmatprep.mubr.f32.mxu0 %v6931_v27  ;;  %v3099_v57 = vsub.f32 %v7056_v25, %v7817_v42  ;;  %v7119_v17 = vsub.f32 %v2863_v47, %v7089_v60  ;;  %v3080_v35 = vand.u32 4294901760, %v3079_v3  ;;  %v3109_v47 = vsub.f32 %v7067_v45, %v7816_v5  ;;  %v2576_v3 = vld [vmem:[%s7813_s11 + $0x98] sm:$0xff] }
 0x581   : > { %7879 = vst [vmem:[#allocation7_spill] sm:$0xff] %v7087_v22  ;;  %5698 = vmatmul.mubr.f32.gmra.mrb[8].mxu1 %v3040_v6  ;;  %6161 = vmatprep.subr.bf16.mxu1 %v6160_v41  ;;  %7880 = vst [vmem:[#allocation8_spill] sm:$0xff] %v7102_v63  ;;  %v2869_v6 = vsel %vm913_vm3, %v2572_v33, 0  ;;  %v7820_v15 = vand.u32 4294901760, %v7087_v22  ;;  %v3090_v33 = vand.u32 4294901760, %v3089_v4  ;;  %v7828_v53 = vand.u32 4294901760, %v7102_v63 }
 0x582   : > { %6177 = vmatprep.subr.bf16.mxu0 %v7018_v44  ;;  %6163 = vmatpush3.bf16.msra.mxu1 %v6160_v41  ;;  %7881 = vst [vmem:[#allocation9_spill] sm:$0xff] %v7119_v17  ;;  %v7125_v36 = vand.u32 4294901760, %v2869_v6  ;;  %v7127_v41 = vand.u32 4294901760, %v2872_v8  ;;  %v3100_v4 = vand.u32 4294901760, %v3099_v57  ;;  %v7826_v5 = vand.u32 4294901760, %v7119_v17 }
 0x583   : > { %6196 = vmatprep.subr.bf16.mxu1 %v7008_v30  ;;  %5828 = vmatmul.mubr.f32.gmra.mrb[6].mxu0 %v6937_v29  ;;  %v3129_v57 = vsub.f32 %v7102_v63, %v7828_v53 }
 0x584   : > { %5700 = vmatprep.mubr.f32.mxu1 %v3050_v1  ;;  %6179 = vmatpush3.bf16.msra.mxu0 %v7018_v44  ;;  %v2875_v1 = vsel %vm913_vm3, %v2574_v9, 0  ;;  %v2577_v9 = vld [vmem:[%s7813_s11 + $0xa0] sm:$0xff]  ;;  %v7155_v43 = vsub.f32 %v2869_v6, %v7125_v36  ;;  %v7158_v7 = vsub.f32 %v2872_v8, %v7127_v41  ;;  %v2578_v6 = vld [vmem:[%s7813_s11 + $0xa8] sm:$0xff]  ;;  %v3139_v26 = vsub.f32 %v7119_v17, %v7826_v5 }
 0x585   : > { %5701 = vmatmul.mubr.f32.gmra.mrb[10].mxu1 %v3060_v56  ;;  %6181 = vmatprep.subr.bf16.mxu0 %v7021_v49  ;;  %v7136_v56 = vsub.f32 %v2866_v50, %v7104_v48  ;;  %v3119_v50 = vsub.f32 %v7087_v22, %v7820_v15  ;;  %v7152_v42 = vand.u32 4294901760, %v2875_v1  ;;  %v2884_v11 = vsel %vm913_vm3, %v2577_v9, 0 }
 0x586   : > { %5830 = vmatprep.mubr.f32.mxu0 %v6966_v46  ;;  %5703 = vmatprep.mubr.f32.mxu1 %v3070_v62  ;;  %v2878_v62 = vsel %vm913_vm3, %v2575_v18, 0  ;;  %7883 = vst [vmem:[#allocation11_spill] sm:$0xff] %v7155_v43  ;;  %7884 = vst [vmem:[#allocation12_spill] sm:$0xff] %v7158_v7  ;;  %v2881_v18 = vsel %vm913_vm3, %v2576_v3, 0  ;;  %v2579_v3 = vld [vmem:[%s7813_s11 + $0xb0] sm:$0xff]  ;;  %v7822_v27 = vand.u32 4294901760, %v7155_v43 }
 0x587   : > { %7882 = vst [vmem:[#allocation10_spill] sm:$0xff] %v7136_v56  ;;  %5831 = vmatmul.mubr.f32.gmra.mrb[8].mxu0 %v6975_v51  ;;  %v7824_v15 = vand.u32 4294901760, %v7136_v56  ;;  %v7166_v39 = vand.u32 4294901760, %v2878_v62  ;;  %v3120_v8 = vand.u32 4294901760, %v3119_v50  ;;  %v2580_v50 = vld [vmem:[%s7813_s11 + $0xb8] sm:$0xff] }
 0x588   : > { %5889 = vmatprep.mubr.f32.mxu0 %v3008_v12  ;;  %v3110_v12 = vand.u32 4294901760, %v3109_v47  ;;  %v7181_v47 = vand.u32 4294901760, %v2884_v11  ;;  %v3159_v46 = vsub.f32 %v7155_v43, %v7822_v27  ;;  %v7888_v27 = vand.u32 4294901760, %v6994_v59 }
 0x589   : > { %5704 = vmatmul.mubr.f32.gmra.mrb[12].mxu1 %v3080_v35  ;;  %v7177_v35 = vsub.f32 %v2875_v1, %v7152_v42  ;;  %v3149_v1 = vsub.f32 %v7136_v56, %v7824_v15  ;;  %v7197_v9 = vsub.f32 %v2878_v62, %v7166_v39 }
 0x58a   : > { %5706 = vmatprep.mubr.f32.mxu1 %v3090_v33  ;;  %v7179_v33 = vand.u32 4294901760, %v2881_v18  ;;  %v7213_v62 = vsub.f32 %v2884_v11, %v7181_v47 }
 0x58b   : > { %5890 = vmatmul.mubr.f32.vlgmr.msra.gmra.mrb[4].mxu0 %v3018_v31  ;;  %7885 = vst [vmem:[#allocation13_spill] sm:$0xff] %v7177_v35  ;;  %v7823_v31 = vand.u32 4294901760, %v7158_v7  ;;  %7886 = vst [vmem:[#allocation14_spill] sm:$0xff] %v7197_v9  ;;  %v7827_v11 = vand.u32 4294901760, %v7197_v9 }
 0x58c   : > { %6183 = vmatpush3.bf16.msra.mxu0 %v7021_v49  ;;  %5892 = vmatprep.mubr.f32.mxu0 %v3028_v32  ;;  %v2887_v32 = vsel %vm913_vm3, %v2578_v6, 0  ;;  %v3130_v49 = vand.u32 4294901760, %v3129_v57  ;;  %v7210_v57 = vsub.f32 %v2881_v18, %v7179_v33  ;;  %7887 = vst [vmem:[#allocation15_spill] sm:$0xff] %v7213_v62  ;;  %v3150_v18 = vand.u32 4294901760, %v3149_v1 }
 0x58d   : > { %6185 = vmatprep.subr.bf16.mxu0 %v7048_v14  ;;  %5707 = vmatmul.mubr.f32.gmra.mrb[14].mxu1 %v3100_v4  ;;  %v2890_v4 = vsel %vm913_vm3, %v2579_v3, 0  ;;  %v7215_v29 = vand.u32 4294901760, %v2887_v32  ;;  %v2893_v3 = vsel %vm913_vm3, %v2580_v50, 0  ;;  %v7833_v50 = vand.u32 4294901760, %v7213_v62 }
 0x58e   : > { %5709 = vmatprep.mubr.f32.mxu1 %v3110_v12  ;;  %v7825_v12 = vand.u32 4294901760, %v7177_v35  ;;  %v7228_v6 = vand.u32 4294901760, %v2890_v4  ;;  %v7831_v1 = vand.u32 4294901760, %v7210_v57  ;;  %v7250_v15 = vand.u32 4294901760, %v2893_v3 }
 0x58f   : > { %5893 = vmatmul.mubr.f32.gmra.mrb[6].mxu0 %v3038_v37  ;;  %v2581_v37 = vld [vmem:[%s7813_s11 + $0xc0] sm:$0xff]  ;;  %v7245_v51 = vsub.f32 %v2887_v32, %v7215_v29  ;;  %v3209_v53 = vsub.f32 %v7213_v62, %v7833_v50 }
 0x590   : > { %6187 = vmatpush3.bf16.msra.mxu0 %v7048_v14  ;;  %5895 = vmatprep.mubr.f32.mxu0 %v3048_v0  ;;  %v3140_v14 = vand.u32 4294901760, %v3139_v26  ;;  %v3169_v0 = vsub.f32 %v7158_v7, %v7823_v31  ;;  %v2582_v26 = vld [vmem:[%s7813_s11 + $0xc8] sm:$0xff]  ;;  %7889 = vst [vmem:[#allocation16_spill] sm:$0xff] %v7250_v15 }
 0x591   : > { %6189 = vmatprep.subr.bf16.mxu0 %v6999_v13  ;;  %5710 = vmatmul.mubr.f32.gmra.mrb[16].mxu1 %v3120_v8  ;;  %v2896_v8 = vsel %vm913_vm3, %v2581_v37, 0  ;;  %v3160_v37 = vand.u32 4294901760, %v3159_v46  ;;  %v2899_v32 = vsel %vm913_vm3, %v2582_v26, 0  ;;  %v2585_v46 = vld [vmem:[%s7813_s11 + $0xe0] sm:$0xff]  ;;  %v3199_v26 = vsub.f32 %v7210_v57, %v7831_v1 }
 0x592   : > { %5712 = vmatprep.mubr.f32.mxu1 %v3130_v49  ;;  %v3179_v49 = vsub.f32 %v7177_v35, %v7825_v12  ;;  %v3170_v31 = vand.u32 4294901760, %v3169_v0  ;;  %v7256_v12 = vsub.f32 %v2890_v4, %v7228_v6  ;;  %v7258_v5 = vand.u32 4294901760, %v2896_v8 }
 0x593   : > { %5896 = vmatmul.mubr.f32.gmra.mrb[8].mxu0 %v3058_v58  ;;  %v2583_v58 = vld [vmem:[%s7813_s11 + $0xd0] sm:$0xff]  ;;  %v7891_v0 = vand.u32 4294901760, %v7003_v19  ;;  %v7892_v4 = vand.u32 4294901760, %v7025_v54  ;;  %v7839_v59 = vand.u32 4294901760, %v7245_v51  ;;  %v7280_v19 = vsub.f32 %v2893_v3, %v7250_v15  ;;  %v2586_v3 = vld [vmem:[%s7813_s11 + $0xe8] sm:$0xff] }
 0x594   : > { %5898 = vmatprep.mubr.f32.mxu0 %v7888_v27  ;;  %v3189_v27 = vsub.f32 %v7197_v9, %v7827_v11  ;;  %7890 = vst [vmem:[#allocation17_spill] sm:$0xff] %v7258_v5  ;;  %v3180_v11 = vand.u32 4294901760, %v3179_v49  ;;  %v2908_v49 = vsel %vm913_vm3, %v2585_v46, 0  ;;  %v7288_v54 = vsub.f32 %v2896_v8, %v7258_v5 }
 0x595   : > { %5713 = vmatmul.mubr.f32.gmra.mrb[18].mxu1 %v3140_v14  ;;  %v2584_v14 = vld [vmem:[%s7813_s11 + $0xd8] sm:$0xff]  ;;  %v3219_v8 = vsub.f32 %v7245_v51, %v7839_v59  ;;  %v7307_v1 = vand.u32 4294901760, %v2908_v49  ;;  %v3210_v5 = vand.u32 4294901760, %v3209_v53  ;;  %v2911_v15 = vsel %vm913_vm3, %v2586_v3, 0 }
 0x596   : > { %5715 = vmatprep.mubr.f32.mxu1 %v3150_v18  ;;  %v2902_v18 = vsel %vm913_vm3, %v2583_v58, 0  ;;  %v2905_v58 = vsel %vm913_vm3, %v2584_v14, 0  ;;  %v2587_v14 = vld [vmem:[%s7813_s11 + $0xf0] sm:$0xff]  ;;  %v7900_v53 = vand.u32 4294901760, %v7087_v22 }
 0x597   : > { %5899 = vmatmul.mubr.f32.gmra.mrb[10].mxu0 %v7891_v0  ;;  %v7282_v0 = vand.u32 4294901760, %v2899_v32  ;;  %v7290_v50 = vand.u32 4294901760, %v2902_v18  ;;  %v7305_v46 = vand.u32 4294901760, %v2905_v58  ;;  %7898 = vst [vmem:[#allocation21_spill] sm:$0xff] %v7307_v1 }
 0x598   : > { %5901 = vmatprep.mubr.f32.mxu0 %v7892_v4  ;;  %v3190_v4 = vand.u32 4294901760, %v3189_v27  ;;  %v3200_v27 = vand.u32 4294901760, %v3199_v26  ;;  %v7899_v26 = vand.u32 4294901760, %v7256_v12 }
 0x599   : > { %5716 = vmatmul.mubr.f32.gmra.mrb[20].mxu1 %v3160_v37  ;;  %7893 = vst [vmem:[#allocation18_spill] sm:$0xff] %v7282_v0  ;;  %7894 = vst [vmem:[#allocation19_spill] sm:$0xff] %v7290_v50  ;;  %v7895_v37 = vand.u32 4294901760, %v7056_v25  ;;  %v7311_v25 = vsub.f32 %v2899_v32, %v7282_v0  ;;  %v2588_v32 = vld [vmem:[%s7813_s11 + $0xf8] sm:$0xff]  ;;  %v7330_v3 = vsub.f32 %v2905_v58, %v7305_v46  ;;  %v7917_v0 = vand.u32 4294901760, %v7177_v35 }
 0x59a   : > { %5718 = vmatprep.mubr.f32.mxu1 %v3170_v31  ;;  %v7896_v31 = vand.u32 4294901760, %v7067_v45  ;;  %7897 = vst [vmem:[#allocation20_spill] sm:$0xff] %v7305_v46  ;;  %v7319_v45 = vsub.f32 %v2902_v18, %v7290_v50  ;;  %v7335_v18 = vand.u32 4294901760, %v2911_v15  ;;  %v2917_v46 = vsel %vm913_vm3, %v2588_v32, 0  ;;  %v2591_v32 = vld [vmem:[%s7813_s11 + $0x110] sm:$0xff] }
 0x59b   : > { %5902 = vmatmul.mubr.f32.gmra.mrb[12].mxu0 %v7895_v37  ;;  %v7847_v37 = vand.u32 4294901760, %v7280_v19 }
 0x59c   : > { %5904 = vmatprep.mubr.f32.mxu0 %v7896_v31  ;;  %v3229_v31 = vsub.f32 %v7256_v12, %v7899_v26  ;;  %v7333_v26 = vsub.f32 %v2908_v49, %v7307_v1  ;;  %7902 = vst [vmem:[#allocation22_spill] sm:$0xff] %v7335_v18  ;;  %v7904_v49 = vand.u32 4294901760, %v7288_v54  ;;  %v7362_v1 = vsub.f32 %v2911_v15, %v7335_v18 }
 0x59d   : > { %5719 = vmatmul.mubr.f32.gmra.mrb[22].mxu1 %v3180_v11  ;;  %v2914_v11 = vsel %vm913_vm3, %v2587_v14, 0  ;;  %v2589_v14 = vld [vmem:[%s7813_s11 + $0x100] sm:$0xff]  ;;  %v3239_v59 = vsub.f32 %v7280_v19, %v7847_v37  ;;  %v2590_v37 = vld [vmem:[%s7813_s11 + $0x108] sm:$0xff]  ;;  %v7907_v15 = vand.u32 4294901760, %v7319_v45 }
 0x59e   : > { %5721 = vmatprep.mubr.f32.mxu1 %v3190_v4  ;;  %v7901_v4 = vand.u32 4294901760, %v7102_v63  ;;  %v7344_v63 = vand.u32 4294901760, %v2914_v11  ;;  %v3230_v58 = vand.u32 4294901760, %v3229_v31  ;;  %v3249_v22 = vsub.f32 %v7288_v54, %v7904_v49 }
 0x59f   : > { %5905 = vmatmul.mubr.f32.gmra.mrb[14].mxu0 %v7900_v53  ;;  %v3220_v53 = vand.u32 4294901760, %v3219_v8  ;;  %v2920_v8 = vsel %vm913_vm3, %v2589_v14, 0  ;;  %v3240_v14 = vand.u32 4294901760, %v3239_v59  ;;  %v3269_v31 = vsub.f32 %v7319_v45, %v7907_v15 }
 0x5a0   : > { %5907 = vmatprep.mubr.f32.mxu0 %v7901_v4  ;;  %v7850_v4 = vand.u32 4294901760, %v7311_v25  ;;  %7903 = vst [vmem:[#allocation23_spill] sm:$0xff] %v7344_v63  ;;  %v3250_v49 = vand.u32 4294901760, %v3249_v22  ;;  %v7909_v59 = vand.u32 4294901760, %v7155_v43  ;;  %v7911_v22 = vand.u32 4294901760, %v7330_v3 }
 0x5a1   : > { %5722 = vmatmul.mubr.f32.gmra.mrb[24].mxu1 %v3200_v27  ;;  %v7905_v27 = vand.u32 4294901760, %v7119_v17  ;;  %v7378_v17 = vand.u32 4294901760, %v2920_v8 }
 0x5a2   : > { %5724 = vmatprep.mubr.f32.mxu1 %v3210_v5  ;;  %v7906_v5 = vand.u32 4294901760, %v7136_v56  ;;  %v7371_v56 = vsub.f32 %v2914_v11, %v7344_v63  ;;  %v2592_v11 = vld [vmem:[%s7813_s11 + $0x118] sm:$0xff]  ;;  %v3279_v15 = vsub.f32 %v7330_v3, %v7911_v22  ;;  %v7912_v63 = vand.u32 4294901760, %v7333_v26 }
 0x5a3   : > { %5908 = vmatmul.mubr.f32.gmra.mrb[16].mxu0 %v7905_v27  ;;  %v3259_v27 = vsub.f32 %v7311_v25, %v7850_v4  ;;  %7908 = vst [vmem:[#allocation24_spill] sm:$0xff] %v7378_v17  ;;  %v2926_v4 = vsel %vm913_vm3, %v2591_v32, 0  ;;  %v2593_v32 = vld [vmem:[%s7813_s11 + $0x120] sm:$0xff]  ;;  %v3270_v22 = vand.u32 4294901760, %v3269_v31  ;;  %v7406_v50 = vsub.f32 %v2920_v8, %v7378_v17 }
 0x5a4   : > { %5910 = vmatprep.mubr.f32.mxu0 %v7906_v5  ;;  %v7373_v5 = vand.u32 4294901760, %v2917_v46  ;;  %v2929_v43 = vsel %vm913_vm3, %v2592_v11, 0  ;;  %v3280_v31 = vand.u32 4294901760, %v3279_v15  ;;  %v7919_v8 = vand.u32 4294901760, %v7362_v1 }
 0x5a5   : > { %5725 = vmatmul.mubr.f32.gmra.mrb[26].mxu1 %v3220_v53  ;;  %v2923_v53 = vsel %vm913_vm3, %v2590_v37, 0  ;;  %v3289_v37 = vsub.f32 %v7333_v26, %v7912_v63  ;;  %7915 = vst [vmem:[#allocation27_spill] sm:$0xff] %v7406_v50  ;;  %v7408_v63 = vand.u32 4294901760, %v2926_v4  ;;  %v7920_v11 = vand.u32 4294901760, %v7371_v56 }
 0x5a6   : > { %5727 = vmatprep.mubr.f32.mxu1 %v3230_v58  ;;  %v7910_v58 = vand.u32 4294901760, %v7158_v7  ;;  %v7403_v7 = vand.u32 4294901760, %v2923_v53  ;;  %v3299_v18 = vsub.f32 %v7362_v1, %v7919_v8  ;;  %v7429_v17 = vand.u32 4294901760, %v2929_v43 }
 0x5a7   : > { %5911 = vmatmul.mubr.f32.gmra.mrb[18].mxu0 %v7909_v59  ;;  %v3260_v59 = vand.u32 4294901760, %v3259_v27  ;;  %7916 = vst [vmem:[#allocation28_spill] sm:$0xff] %v7408_v63  ;;  %v7918_v27 = vand.u32 4294901760, %v7197_v9  ;;  %v3328_v15 = vand.u32 4294901760, %v7406_v50  ;;  %v7923_v8 = vand.u32 4294901760, %v7210_v57 }
 0x5a8   : > { %5913 = vmatprep.mubr.f32.mxu0 %v7910_v58  ;;  %v7401_v58 = vsub.f32 %v2917_v46, %v7373_v5  ;;  %7914 = vst [vmem:[#allocation26_spill] sm:$0xff] %v7403_v7  ;;  %v2594_v46 = vld [vmem:[%s7813_s11 + $0x128] sm:$0xf]  ;;  %v7427_v35 = vsub.f32 %v2923_v53, %v7403_v7  ;;  %v3300_v53 = vand.u32 4294901760, %v3299_v18  ;;  %v7445_v7 = vsub.f32 %v2929_v43, %v7429_v17 }
 0x5a9   : > { %5728 = vmatmul.mubr.f32.gmra.mrb[28].mxu1 %v3240_v14  ;;  %v2932_v14 = vsel %vm913_vm3, %v2593_v32, 0  ;;  %v7925_v18 = vand.u32 4294901760, %v7245_v51 }
 0x5aa   : > { %7913 = vst [vmem:[#allocation25_spill] sm:$0xff] %v7401_v58  ;;  %5730 = vmatprep.mubr.f32.mxu1 %v3250_v49  ;;  %v3290_v49 = vand.u32 4294901760, %v3289_v37  ;;  %v3318_v32 = vand.u32 4294901760, %v7401_v58  ;;  %7921 = vst [vmem:[#allocation29_spill] sm:$0xff] %v7427_v35  ;;  %v7433_v37 = vsub.f32 %v2926_v4, %v7408_v63 }
 0x5ab   : > { %5914 = vmatmul.mubr.f32.gmra.mrb[20].mxu0 %v7917_v0  ;;  %v3309_v0 = vsub.f32 %v7371_v56, %v7920_v11  ;;  %v7924_v11 = vand.u32 4294901760, %v7213_v62 }
 0x5ac   : > { %5916 = vmatprep.mubr.f32.mxu0 %v7918_v27  ;;  %7922 = vst [vmem:[#allocation30_spill] sm:$0xff] %v7433_v37  ;;  %v7435_v27 = vand.u32 4294901760, %v2932_v14  ;;  %v3319_v9 = vsub.f32 %v7401_v58, %v3318_v32 }
 0x5ad   : > { %5731 = vmatmul.mubr.f32.gmra.mrb[30].mxu1 %v3260_v59  ;;  %v2935_v59 = vsel %vm913_vm3, %v2594_v46, 0  ;;  %v3310_v63 = vand.u32 4294901760, %v3309_v0  ;;  %v3329_v46 = vsub.f32 %v7406_v50, %v3328_v15 }
 0x5ae   : > { %5733 = vmatprep.mubr.f32.mxu1 %v3270_v22  ;;  %v3338_v22 = vand.u32 4294901760, %v7427_v35  ;;  %v7447_v4 = vand.u32 4294901760, %v2935_v59  ;;  %v7452_v62 = vsub.f32 %v2932_v14, %v7435_v27  ;;  %v3320_v43 = vand.u32 4294901760, %v3319_v9 }
 0x5af   : > { %5917 = vmatmul.mubr.f32.gmra.mrb[22].mxu0 %v7923_v8  ;;  %v3348_v8 = vand.u32 4294901760, %v7433_v37  ;;  %v3330_v50 = vand.u32 4294901760, %v3329_v46  ;;  %v7929_v46 = vand.u32 4294901760, %v7311_v25 }
 0x5b0   : > { %5919 = vmatprep.mubr.f32.mxu0 %v7924_v11  ;;  %v3339_v11 = vsub.f32 %v7427_v35, %v3338_v22  ;;  %v7461_v0 = vsub.f32 %v2935_v59, %v7447_v4  ;;  %v3368_v58 = vand.u32 4294901760, %v7452_v62 }
 0x5b1   : > { %5734 = vmatmul.mubr.f32.gmra.mrb[32].mxu1 %v3280_v31  ;;  %v7926_v31 = vand.u32 4294901760, %v7256_v12  ;;  %v3349_v14 = vsub.f32 %v7433_v37, %v3348_v8  ;;  %v7930_v37 = vand.u32 4294901760, %v7319_v45 }
 0x5b2   : > { %5736 = vmatprep.mubr.f32.mxu1 %v3290_v49  ;;  %v3358_v49 = vand.u32 4294901760, %v7445_v7  ;;  %v3340_v9 = vand.u32 4294901760, %v3339_v11  ;;  %v3378_v35 = vand.u32 4294901760, %v7461_v0  ;;  %v7931_v11 = vand.u32 4294901760, %v7330_v3 }
 0x5b3   : > { %5920 = vmatmul.mubr.f32.gmra.mrb[24].mxu0 %v7925_v18  ;;  %v7927_v18 = vand.u32 4294901760, %v7280_v19  ;;  %v3350_v59 = vand.u32 4294901760, %v3349_v14 }
 0x5b4   : > { %5922 = vmatprep.mubr.f32.mxu0 %v7926_v31  ;;  %v7928_v31 = vand.u32 4294901760, %v7288_v54 }
 0x5b5   : > { %5737 = vmatmul.mubr.f32.gmra.mrb[34].mxu1 %v3300_v53  ;;  %v3359_v53 = vsub.f32 %v7445_v7, %v3358_v49 }
 0x5b6   : > { %5739 = vmatprep.mubr.f32.mxu1 %v3310_v63  ;;  %v3369_v63 = vsub.f32 %v7452_v62, %v3368_v58 }
 0x5b7   : > { %5923 = vmatmul.mubr.f32.gmra.mrb[26].mxu0 %v7927_v18  ;;  %v3360_v18 = vand.u32 4294901760, %v3359_v53  ;;  %v7947_v53 = vld [vmem:[#allocation3_spill] sm:$0xff] }
 0x5b8   : > { %5925 = vmatprep.mubr.f32.mxu0 %v7928_v31  ;;  %v3379_v31 = vsub.f32 %v7461_v0, %v3378_v35 }
 0x5b9   : > { %5740 = vmatmul.mubr.f32.gmra.mrb[36].mxu1 %v3320_v43  ;;  %v3370_v43 = vand.u32 4294901760, %v3369_v63  ;;  %v7949_v63 = vld [vmem:[#allocation5_spill] sm:$0xff] }
 0x5ba   : > { %5742 = vmatprep.mubr.f32.mxu1 %v3330_v50  ;;  %v7932_v50 = vand.u32 4294901760, %v7333_v26  ;;  %v3380_v14 = vand.u32 4294901760, %v3379_v31  ;;  %v7951_v31 = vld [vmem:[#allocation7_spill] sm:$0xff] }
 0x5bb   : > { %5926 = vmatmul.mubr.f32.gmra.mrb[28].mxu0 %v7929_v46  ;;  %v7933_v46 = vand.u32 4294901760, %v7362_v1 }
 0x5bc   : > { %5928 = vmatprep.mubr.f32.mxu0 %v7930_v37  ;;  %v7934_v37 = vand.u32 4294901760, %v7371_v56 }
 0x5bd   : > { %5743 = vmatmul.mubr.f32.gmra.mrb[38].mxu1 %v3340_v9  ;;  %v7946_v9 = vld [vmem:[#allocation2_spill] sm:$0xff] }
 0x5be   : > { %5745 = vmatprep.mubr.f32.mxu1 %v3350_v59  ;;  %v7948_v59 = vld [vmem:[#allocation4_spill] sm:$0xff] }
 0x5bf   : > { %5929 = vmatmul.mubr.f32.gmra.mrb[30].mxu0 %v7931_v11  ;;  %v7953_v11 = vld [vmem:[#allocation9_spill] sm:$0xff] }
 0x5c0   : > { %5931 = vmatprep.mubr.f32.mxu0 %v7932_v50  ;;  %v7954_v50 = vld [vmem:[#allocation10_spill] sm:$0xff] }
 0x5c1   : > { %5746 = vmatmul.mubr.f32.gmra.mrb[40].mxu1 %v3360_v18  ;;  %v7950_v18 = vld [vmem:[#allocation6_spill] sm:$0xff] }
 0x5c2   : > { %5748 = vmatprep.mubr.f32.mxu1 %v3370_v43  ;;  %v7952_v43 = vld [vmem:[#allocation8_spill] sm:$0xff] }
 0x5c3   : > { %5932 = vmatmul.mubr.f32.gmra.mrb[32].mxu0 %v7933_v46  ;;  %v7956_v46 = vld [vmem:[#allocation12_spill] sm:$0xff] }
 0x5c4   : > { %5934 = vmatprep.mubr.f32.mxu0 %v7934_v37  ;;  %v7957_v37 = vld [vmem:[#allocation13_spill] sm:$0xff] }
 0x5c5   : > { %5749 = vmatmul.mubr.f32.gmra.mrb[42].mxu1 %v3380_v14  ;;  %v7955_v14 = vld [vmem:[#allocation11_spill] sm:$0xff] }
 0x5c6   : > { %5759 = vmatprep.mubr.f32.mxu1 %v6896_v10 }
 0x5c7   : > { %5935 = vmatmul.mubr.f32.gmra.mrb[34].mxu0 %v3318_v32  ;;  %v7941_v32 = vld [vmem:[#allocation22_spill] sm:$0xff] }
 0x5c8   : > { %5937 = vmatprep.mubr.f32.mxu0 %v3328_v15  ;;  %v7942_v15 = vld [vmem:[#allocation23_spill] sm:$0xff] }
 0x5c9   : > { %5760 = vmatmul.mubr.f32.vlgmr.msra.gmra.mrb[6].mxu1 %v6918_v20 }
 0x5ca   : > { %6198 = vmatpush3.bf16.msra.mxu1 %v7008_v30  ;;  %5762 = vmatprep.mubr.f32.mxu1 %v6920_v21  ;;  %v7936_v30 = vld [vmem:[#allocation17_spill] sm:$0xff] }
 0x5cb   : > { %6197 = vmatprep.subr.bf16.mxu1 %v7033_v61  ;;  %5938 = vmatmul.mubr.f32.gmra.mrb[36].mxu0 %v3338_v22  ;;  %v7943_v22 = vld [vmem:[#allocation24_spill] sm:$0xff] }
 0x5cc   : > { %5940 = vmatprep.mubr.f32.mxu0 %v3348_v8  ;;  %v7944_v8 = vld [vmem:[#allocation26_spill] sm:$0xff] }
 0x5cd   : > { %5763 = vmatmul.mubr.f32.gmra.mrb[8].mxu1 %v6922_v23 }
 0x5ce   : > { %6199 = vmatpush3.bf16.msra.mxu1 %v7033_v61  ;;  %5765 = vmatprep.mubr.f32.mxu1 %v6943_v34  ;;  %v7938_v61 = vld [vmem:[#allocation19_spill] sm:$0xff] }
 0x5cf   : > { %5941 = vmatmul.mubr.f32.gmra.mrb[38].mxu0 %v3358_v49  ;;  %v7945_v49 = vld [vmem:[#allocation28_spill] sm:$0xff] }
 0x5d0   : > { %5943 = vmatprep.mubr.f32.mxu0 %v3368_v58  ;;  %v7940_v58 = vld [vmem:[#allocation21_spill] sm:$0xff] }
 0x5d1   : > { %5766 = vmatmul.mubr.f32.gmra.mrb[10].mxu1 %v6949_v38 }
 0x5d2   : > { %5768 = vmatprep.mubr.f32.mxu1 %v6977_v52 }
 0x5d3   : > { %5944 = vmatmul.mubr.f32.gmra.mrb[40].mxu0 %v3378_v35  ;;  %v7939_v35 = vld [vmem:[#allocation20_spill] sm:$0xff] }
 0x5d4   : > { %5954 = vmatprep.mubr.f32.mxu0 %v6896_v10 }
 0x5d5   : > { %5769 = vmatmul.mubr.f32.gmra.mrb[12].mxu1 %v6985_v2 }
 0x5d6   : > { %5771 = vmatprep.mubr.f32.mxu1 %v7005_v24 }
 0x5d7   : > { %5955 = vmatmul.mubr.f32.vlgmr.msra.gmra.mrb[4].mxu0 %v6918_v20 }
 0x5d8   : > { %6191 = vmatpush3.bf16.msra.mxu0 %v6999_v13  ;;  %5957 = vmatprep.mubr.f32.mxu0 %v6920_v21  ;;  %v7935_v13 = vld [vmem:[#allocation16_spill] sm:$0xff] }
 0x5d9   : > { %6193 = vmatprep.subr.bf16.mxu0 %v7018_v44  ;;  %5772 = vmatmul.mubr.f32.gmra.mrb[14].mxu1 %v7013_v40 }
 0x5da   : > { %5774 = vmatprep.mubr.f32.mxu1 %v7027_v55 }
 0x5db   : > { %5958 = vmatmul.mubr.f32.gmra.mrb[6].mxu0 %v6922_v23 }
 0x5dc   : > { %6195 = vmatpush3.bf16.msra.mxu0 %v7018_v44  ;;  %5960 = vmatprep.mubr.f32.mxu0 %v6943_v34  ;;  %v7937_v44 = vld [vmem:[#allocation18_spill] sm:$0xff] }
 0x5dd   : > { %5775 = vmatmul.mubr.f32.gmra.mrb[16].mxu1 %v7058_v28 }
 0x5de   : > { %5777 = vmatprep.mubr.f32.mxu1 %v7071_v16 }
 0x5df   : > { %5961 = vmatmul.mubr.f32.gmra.mrb[8].mxu0 %v6949_v38 }
 0x5e0   : > { %5963 = vmatprep.mubr.f32.mxu0 %v6977_v52 }
 0x5e1   : > { %5778 = vmatmul.mubr.f32.gmra.mrb[18].mxu1 %v7089_v60 }
 0x5e2   : > { %5780 = vmatprep.mubr.f32.mxu1 %v7104_v48 }
 0x5e3   : > { %5964 = vmatmul.mubr.f32.gmra.mrb[10].mxu0 %v6985_v2 }
 0x5e4   : > { %5966 = vmatprep.mubr.f32.mxu0 %v7005_v24 }
 0x5e5   : > { %5781 = vmatmul.mubr.f32.gmra.mrb[20].mxu1 %v7125_v36 }
 0x5e6   : > { %5783 = vmatprep.mubr.f32.mxu1 %v7127_v41 }
 0x5e7   : > { %5967 = vmatmul.mubr.f32.gmra.mrb[12].mxu0 %v7013_v40 }
 0x5e8   : > { %5969 = vmatprep.mubr.f32.mxu0 %v7027_v55 }
 0x5e9   : > { %5784 = vmatmul.mubr.f32.gmra.mrb[22].mxu1 %v7152_v42 }
 0x5ea   : > { %5786 = vmatprep.mubr.f32.mxu1 %v7166_v39 }
 0x5eb   : > { %5970 = vmatmul.mubr.f32.gmra.mrb[14].mxu0 %v7058_v28 }
 0x5ec   : > { %5972 = vmatprep.mubr.f32.mxu0 %v7071_v16 }
 0x5ed   : > { %5787 = vmatmul.mubr.f32.gmra.mrb[24].mxu1 %v7179_v33 }
 0x5ee   : > { %5789 = vmatprep.mubr.f32.mxu1 %v7181_v47 }
 0x5ef   : > { %5973 = vmatmul.mubr.f32.gmra.mrb[16].mxu0 %v7089_v60 }
 0x5f0   : > { %5975 = vmatprep.mubr.f32.mxu0 %v7104_v48 }
 0x5f1   : > { %5790 = vmatmul.mubr.f32.gmra.mrb[26].mxu1 %v7215_v29 }
 0x5f2   : > { %5792 = vmatprep.mubr.f32.mxu1 %v7228_v6 }
 0x5f3   : > { %5976 = vmatmul.mubr.f32.gmra.mrb[18].mxu0 %v7125_v36 }
 0x5f4   : > { %5978 = vmatprep.mubr.f32.mxu0 %v7127_v41 }
 0x5f5   : > { %5793 = vmatmul.mubr.f32.gmra.mrb[28].mxu1 %v7935_v13 }
 0x5f6   : > { %5795 = vmatprep.mubr.f32.mxu1 %v7936_v30 }
 0x5f7   : > { %5979 = vmatmul.mubr.f32.gmra.mrb[20].mxu0 %v7152_v42 }
 0x5f8   : > { %5981 = vmatprep.mubr.f32.mxu0 %v7166_v39 }
 0x5f9   : > { %5796 = vmatmul.mubr.f32.gmra.mrb[30].mxu1 %v7937_v44 }
 0x5fa   : > { %5798 = vmatprep.mubr.f32.mxu1 %v7938_v61 }
 0x5fb   : > { %5982 = vmatmul.mubr.f32.gmra.mrb[22].mxu0 %v7179_v33 }
 0x5fc   : > { %5984 = vmatprep.mubr.f32.mxu0 %v7181_v47 }
 0x5fd   : > { %5799 = vmatmul.mubr.f32.gmra.mrb[32].mxu1 %v7939_v35 }
 0x5fe   : > { %5801 = vmatprep.mubr.f32.mxu1 %v7940_v58 }
 0x5ff   : > { %5985 = vmatmul.mubr.f32.gmra.mrb[24].mxu0 %v7215_v29 }
 0x600   : > { %5987 = vmatprep.mubr.f32.mxu0 %v7228_v6 }
 0x601   : > { %5802 = vmatmul.mubr.f32.gmra.mrb[34].mxu1 %v7941_v32 }
 0x602   : > { %5804 = vmatprep.mubr.f32.mxu1 %v7942_v15 }
 0x603   : > { %5988 = vmatmul.mubr.f32.gmra.mrb[26].mxu0 %v7935_v13 }
 0x604   : > { %5990 = vmatprep.mubr.f32.mxu0 %v7936_v30 }
 0x605   : > { %5805 = vmatmul.mubr.f32.gmra.mrb[36].mxu1 %v7373_v5 }
 0x606   : > { %5807 = vmatprep.mubr.f32.mxu1 %v7943_v22 }
 0x607   : > { %5991 = vmatmul.mubr.f32.gmra.mrb[28].mxu0 %v7937_v44 }
 0x608   : > { %5993 = vmatprep.mubr.f32.mxu0 %v7938_v61 }
 0x609   : > { %5808 = vmatmul.mubr.f32.gmra.mrb[38].mxu1 %v7944_v8 }
 0x60a   : > { %5810 = vmatprep.mubr.f32.mxu1 %v7945_v49 }
 0x60b   : > { %5994 = vmatmul.mubr.f32.gmra.mrb[30].mxu0 %v7939_v35 }
 0x60c   : > { %5996 = vmatprep.mubr.f32.mxu0 %v7940_v58 }
 0x60d   : > { %5811 = vmatmul.mubr.f32.gmra.mrb[40].mxu1 %v7429_v17 }
 0x60e   : > { %5813 = vmatprep.mubr.f32.mxu1 %v7435_v27 }
 0x60f   : > { %5997 = vmatmul.mubr.f32.gmra.mrb[32].mxu0 %v7941_v32 }
 0x610   : > { %5999 = vmatprep.mubr.f32.mxu0 %v7942_v15 }
 0x611   : > { %5814 = vmatmul.mubr.f32.gmra.mrb[42].mxu1 %v7447_v4 }
 0x612   : > { %5833 = vmatprep.mubr.f32.mxu1 %v7946_v9  ;;  %v7958_v9 = vld [vmem:[#allocation14_spill] sm:$0xff] }
 0x613   : > { %6000 = vmatmul.mubr.f32.gmra.mrb[34].mxu0 %v7373_v5 }
 0x614   : > { %6002 = vmatprep.mubr.f32.mxu0 %v7943_v22 }
 0x615   : > { %5834 = vmatmul.mubr.f32.vlgmr.msra.gmra.mrb[12].mxu1 %v7947_v53 }
 0x616   : > { %5836 = vmatprep.mubr.f32.mxu1 %v7948_v59 }
 0x617   : > { %6003 = vmatmul.mubr.f32.gmra.mrb[36].mxu0 %v7944_v8 }
 0x618   : > { %6005 = vmatprep.mubr.f32.mxu0 %v7945_v49 }
 0x619   : > { %5837 = vmatmul.mubr.f32.gmra.mrb[14].mxu1 %v7949_v63 }
 0x61a   : > { %5839 = vmatprep.mubr.f32.mxu1 %v7950_v18 }
 0x61b   : > { %6006 = vmatmul.mubr.f32.gmra.mrb[38].mxu0 %v7429_v17 }
 0x61c   : > { %6008 = vmatprep.mubr.f32.mxu0 %v7435_v27 }
 0x61d   : > { %5840 = vmatmul.mubr.f32.gmra.mrb[16].mxu1 %v7951_v31 }
 0x61e   : > { %5842 = vmatprep.mubr.f32.mxu1 %v7952_v43 }
 0x61f   : > { %6009 = vmatmul.mubr.f32.gmra.mrb[40].mxu0 %v7447_v4 }
 0x620   : > { %6019 = vmatprep.mubr.f32.mxu0 %v6896_v10  ;;  %v7959_v10 = vld [vmem:[#allocation15_spill] sm:$0xff] }
 0x621   : > { %5843 = vmatmul.mubr.f32.gmra.mrb[18].mxu1 %v7953_v11 }
 0x622   : > { %5845 = vmatprep.mubr.f32.mxu1 %v7954_v50 }
 0x623   : > { %6020 = vmatmul.mubr.f32.vlgmr.msra.gmra.mrb[4].mxu0 %v6918_v20  ;;  %v7960_v20 = vld [vmem:[#allocation25_spill] sm:$0xff] }
 0x624   : > { %6022 = vmatprep.mubr.f32.mxu0 %v6920_v21  ;;  %v7961_v21 = vld [vmem:[#allocation27_spill] sm:$0xff] }
 0x625   : > { %5846 = vmatmul.mubr.f32.gmra.mrb[20].mxu1 %v7955_v14 }
 0x626   : > { %5848 = vmatprep.mubr.f32.mxu1 %v7956_v46 }
 0x627   : > { %6023 = vmatmul.mubr.f32.gmra.mrb[6].mxu0 %v6922_v23  ;;  %v7962_v23 = vld [vmem:[#allocation29_spill] sm:$0xff] }
 0x628   : > { %6025 = vmatprep.mubr.f32.mxu0 %v6943_v34  ;;  %v7963_v34 = vld [vmem:[#allocation30_spill] sm:$0xff] }
 0x629   : > { %5849 = vmatmul.mubr.f32.gmra.mrb[22].mxu1 %v7957_v37 }
 0x62a   : > { %5851 = vmatprep.mubr.f32.mxu1 %v7958_v9 }
 0x62b   : > { %6026 = vmatmul.mubr.f32.gmra.mrb[8].mxu0 %v6949_v38 }
 0x62c   : > { %6028 = vmatprep.mubr.f32.mxu0 %v6977_v52 }
 0x62d   : > { %5852 = vmatmul.mubr.f32.gmra.mrb[24].mxu1 %v7210_v57 }
 0x62e   : > { %5854 = vmatprep.mubr.f32.mxu1 %v7959_v10 }
 0x62f   : > { %6029 = vmatmul.mubr.f32.gmra.mrb[10].mxu0 %v6985_v2 }
 0x630   : > { %6031 = vmatprep.mubr.f32.mxu0 %v7005_v24 }
 0x631   : > { %5855 = vmatmul.mubr.f32.gmra.mrb[26].mxu1 %v7245_v51 }
 0x632   : > { %5857 = vmatprep.mubr.f32.mxu1 %v7256_v12 }
 0x633   : > { %6032 = vmatmul.mubr.f32.gmra.mrb[12].mxu0 %v7013_v40  ;;  %v2636_v40 = vpop.permute.xlu1 %2635 }
 0x634   : > { %6034 = vmatprep.mubr.f32.mxu0 %v7027_v55 }
 0x635   : > { %5858 = vmatmul.mubr.f32.gmra.mrb[28].mxu1 %v7280_v19 }
 0x636   : > { %5860 = vmatprep.mubr.f32.mxu1 %v7288_v54 }
 0x637   : > { %6035 = vmatmul.mubr.f32.gmra.mrb[14].mxu0 %v7058_v28  ;;  %v2641_v54 = vpop.permute.xlu1 %2640 }
 0x638   : > { %6037 = vmatprep.mubr.f32.mxu0 %v7071_v16 }
 0x639   : > { %5861 = vmatmul.mubr.f32.gmra.mrb[30].mxu1 %v7311_v25 }
 0x63a   : > { %5863 = vmatprep.mubr.f32.mxu1 %v7319_v45 }
 0x63b   : > { %6038 = vmatmul.mubr.f32.gmra.mrb[16].mxu0 %v7089_v60  ;;  %v2646_v55 = vpop.permute.xlu1 %2645 }
 0x63c   : > { %6040 = vmatprep.mubr.f32.mxu0 %v7104_v48 }
 0x63d   : > { %5864 = vmatmul.mubr.f32.gmra.mrb[32].mxu1 %v7330_v3 }
 0x63e   : > { %5866 = vmatprep.mubr.f32.mxu1 %v7333_v26 }
 0x63f   : > { %6041 = vmatmul.mubr.f32.gmra.mrb[18].mxu0 %v7125_v36 }
 0x640   : > { %6043 = vmatprep.mubr.f32.mxu0 %v7127_v41 }
 0x641   : > { %5867 = vmatmul.mubr.f32.gmra.mrb[34].mxu1 %v7362_v1 }
 0x642   : > { %5869 = vmatprep.mubr.f32.mxu1 %v7371_v56 }
 0x643   : > { %6044 = vmatmul.mubr.f32.gmra.mrb[20].mxu0 %v7152_v42 }
 0x644   : > { %6046 = vmatprep.mubr.f32.mxu0 %v7166_v39 }
 0x645   : > { %5870 = vmatmul.mubr.f32.gmra.mrb[36].mxu1 %v7960_v20 }
 0x646   : > { %5872 = vmatprep.mubr.f32.mxu1 %v7961_v21 }
 0x647   : > { %6047 = vmatmul.mubr.f32.gmra.mrb[22].mxu0 %v7179_v33  ;;  %v7639_v33 = vpop.permute.xlu0 %2685 }
 0x648   : > { %6049 = vmatprep.mubr.f32.mxu0 %v7181_v47 }
 0x649   : > { %5873 = vmatmul.mubr.f32.gmra.mrb[38].mxu1 %v7962_v23 }
 0x64a   : > { %5875 = vmatprep.mubr.f32.mxu1 %v7963_v34 }
 0x64b   : > { %6050 = vmatmul.mubr.f32.gmra.mrb[24].mxu0 %v7215_v29  ;;  %v7648_v29 = vpop.permute.xlu0 %2695 }
 0x64c   : > { %6052 = vmatprep.mubr.f32.mxu0 %v7228_v6 }
 0x64d   : > { %5876 = vmatmul.mubr.f32.gmra.mrb[40].mxu1 %v7445_v7  ;;  %v2651_v7 = vpop.permute.xlu1 %2650 }
 0x64e   : > { %5878 = vmatprep.mubr.f32.mxu1 %v7452_v62 }
 0x64f   : > { %6053 = vmatmul.mubr.f32.gmra.mrb[26].mxu0 %v7935_v13 }
 0x650   : > { %6055 = vmatprep.mubr.f32.mxu0 %v7936_v30 }
 0x651   : > { %5879 = vmatmul.mubr.f32.gmra.mrb[42].mxu1 %v7461_v0  ;;  %v2656_v25 = vpop.permute.xlu1 %2655 }
 0x653   : > { %6056 = vmatmul.mubr.f32.gmra.mrb[28].mxu0 %v7937_v44 }
 0x654   : > { %6058 = vmatprep.mubr.f32.mxu0 %v7938_v61 }
 0x655   : > { %v2661_v28 = vpop.permute.xlu1 %2660 }
 0x657   : > { %6059 = vmatmul.mubr.f32.gmra.mrb[30].mxu0 %v7939_v35  ;;  %v7667_v35 = vpop.permute.xlu0 %2705 }
 0x658   : > { %6061 = vmatprep.mubr.f32.mxu0 %v7940_v58 }
 0x659   : > { %v2666_v45 = vpop.permute.xlu1 %2665 }
 0x65b   : > { %6062 = vmatmul.mubr.f32.gmra.mrb[32].mxu0 %v7941_v32  ;;  %v2716_v50 = vpop.permute.xlu0 %2715 }
 0x65c   : > { %6064 = vmatprep.mubr.f32.mxu0 %v7942_v15 }
 0x65d   : > { %v2671_v16 = vpop.permute.xlu1 %2670 }
 0x65f   : > { %6065 = vmatmul.mubr.f32.gmra.mrb[34].mxu0 %v7373_v5 }
 0x660   : > { %6067 = vmatprep.mubr.f32.mxu0 %v7943_v22 }
 0x661   : > { %v2676_v42 = vpop.permute.xlu1 %2675 }
 0x663   : > { %6068 = vmatmul.mubr.f32.gmra.mrb[36].mxu0 %v7944_v8 }
 0x664   : > { %6070 = vmatprep.mubr.f32.mxu0 %v7945_v49 }
 0x665   : > { %v2681_v60 = vpop.permute.xlu1 %2680 }
 0x667   : > { %6071 = vmatmul.mubr.f32.gmra.mrb[38].mxu0 %v7429_v17 }
 0x668   : > { %6073 = vmatprep.mubr.f32.mxu0 %v7435_v27 }
 0x669   : > { %v7637_v56 = vpop.permute.xlu1 %2690 }
 0x66b   : > { %6074 = vmatmul.mubr.f32.gmra.mrb[40].mxu0 %v7447_v4 }
 0x66d   : > { %v7644_v57 = vpop.permute.xlu1 %2700 }
 0x671   : > { %v7663_v30 = vpop.permute.xlu1 %2710 }
 0x675   : > { %v2721_v31 = vpop.permute.xlu1 %2720 }
 0x69c   : > { %v5761_v38 = vpop.f32.mrb[6].mxu1 }
 0x69d   : > { %v3473_v52 = vpop.f32.mrb[7].mxu1  ;;  %v6207_v6 = vadd.f32 %v5761_v38, %v2641_v54 }
 0x69e   : > { %v6209_v51 = vadd.f32 %v3473_v52, %v2636_v40  ;;  %v2731_v52 = vpop.permute.xlu1 %2730 }
 0x6a0   : > { %v5764_v2 = vpop.f32.mrb[8].mxu1 }
 0x6a1   : > { %v3485_v19 = vpop.f32.mrb[9].mxu1  ;;  %v6211_v0 = vadd.f32 %v5764_v2, %v2651_v7 }
 0x6a2   : > { %v6213_v44 = vadd.f32 %v3485_v19, %v2646_v55 }
 0x6a4   : > { %v5767_v24 = vpop.f32.mrb[10].mxu1 }
 0x6a5   : > { %v3497_v39 = vpop.f32.mrb[11].mxu1  ;;  %v6215_v8 = vadd.f32 %v5767_v24, %v2661_v28  ;;  %v2726_v24 = vpop.permute.xlu0 %2725 }
 0x6a6   : > { %v6217_v53 = vadd.f32 %v3497_v39, %v2656_v25 }
 0x6e8   : > { %v5835_v48 = vpop.f32.mrb[12].mxu1 }
 0x6e9   : > { %v3817_v17 = vpop.f32.mrb[13].mxu1  ;;  %v6219_v14 = vadd.f32 %v5835_v48, %v2671_v16 }
 0x6ea   : > { %v6221_v37 = vadd.f32 %v3817_v17, %v2666_v45 }
 0x6ec   : > { %v5838_v36 = vpop.f32.mrb[14].mxu1 }
 0x6ed   : > { %v3831_v41 = vpop.f32.mrb[15].mxu1  ;;  %v6223_v34 = vadd.f32 %v5838_v36, %v2681_v60  ;;  %v2741_v60 = vpop.permute.xlu1 %2740 }
 0x6ee   : > { %v6225_v2 = vadd.f32 %v3831_v41, %v2676_v42  ;;  %v2736_v36 = vpop.permute.xlu0 %2735 }
 0x6f0   : > { %v5841_v47 = vpop.f32.mrb[16].mxu1 }
 0x6f1   : > { %v7641_v12 = vpop.f32.mrb[17].mxu1  ;;  %v6227_v7 = vadd.f32 %v5841_v47, %v7637_v56 }
 0x6f2   : > { %v6229_v28 = vadd.f32 %v7641_v12, %v7639_v33 }
 0x6f4   : > { %v7646_v62 = vpop.f32.mrb[18].mxu1 }
 0x6f5   : > { %v7650_v1 = vpop.f32.mrb[19].mxu1  ;;  %v6231_v41 = vadd.f32 %v7646_v62, %v7644_v57  ;;  %v2751_v62 = vpop.permute.xlu1 %2750 }
 0x6f6   : > { %v6021_v3 = vpop.f32.mrb[4].mxu0  ;;  %v6233_v33 = vadd.f32 %v7650_v1, %v7648_v29 }
 0x6f7   : > { %v6208_v26 = vadd.f32 %v6207_v6, %v6021_v3  ;;  %v4787_v5 = vpop.f32.mrb[5].mxu0 }
 0x6f8   : > { %v6210_v27 = vadd.f32 %v6209_v51, %v4787_v5  ;;  %v7657_v4 = vpop.f32.mrb[20].mxu1  ;;  %v2746_v5 = vpop.permute.xlu0 %2745 }
 0x6f9   : > { %5015 = vst.msk [vmem:[%s7655_s18 + $0x8] sm:$0xff] %vm5013_vm7, %v6208_v26  ;;  %v7661_v13 = vpop.f32.mrb[21].mxu1  ;;  %v6235_v26 = vadd.f32 %v7657_v4, %v7663_v30 }
 0x6fa   : > { %5014 = vst.msk [vmem:[%s7655_s18] sm:$0xff] %vm5013_vm7, %v6210_v27  ;;  %v6024_v61 = vpop.f32.mrb[6].mxu0  ;;  %v6237_v29 = vadd.f32 %v7661_v13, %v7667_v35 }
 0x6fb   : > { %v6212_v58 = vadd.f32 %v6211_v0, %v6024_v61  ;;  %v4799_v32 = vpop.f32.mrb[7].mxu0 }
 0x6fc   : > { %v6214_v15 = vadd.f32 %v6213_v44, %v4799_v32  ;;  %v7669_v22 = vpop.f32.mrb[22].mxu1 }
 0x6fd   : > { %5017 = vst.msk [vmem:[%s7655_s18 + $0x18] sm:$0xff] %vm5013_vm7, %v6212_v58  ;;  %v7673_v49 = vpop.f32.mrb[23].mxu1  ;;  %v6239_v4 = vadd.f32 %v7669_v22, %v2721_v31 }
 0x6fe   : > { %5016 = vst.msk [vmem:[%s7655_s18 + $0x10] sm:$0xff] %vm5013_vm7, %v6214_v15  ;;  %v6027_v59 = vpop.f32.mrb[8].mxu0  ;;  %v6241_v58 = vadd.f32 %v7673_v49, %v2716_v50  ;;  %v2761_v15 = vpop.permute.xlu1 %2760 }
 0x6ff   : > { %v6216_v63 = vadd.f32 %v6215_v8, %v6027_v59  ;;  %v4811_v18 = vpop.f32.mrb[9].mxu0  ;;  %v2756_v59 = vpop.permute.xlu0 %2755 }
 0x700   : > { %v6218_v43 = vadd.f32 %v6217_v53, %v4811_v18  ;;  %v7677_v11 = vpop.f32.mrb[24].mxu1 }
 0x701   : > { %5019 = vst.msk [vmem:[%s7655_s18 + $0x28] sm:$0xff] %vm5013_vm7, %v6216_v63  ;;  %v7681_v46 = vpop.f32.mrb[25].mxu1  ;;  %v6243_v22 = vadd.f32 %v7677_v11, %v2731_v52 }
 0x702   : > { %5018 = vst.msk [vmem:[%s7655_s18 + $0x20] sm:$0xff] %vm5013_vm7, %v6218_v43  ;;  %v6030_v9 = vpop.f32.mrb[10].mxu0  ;;  %v6245_v49 = vadd.f32 %v7681_v46, %v2726_v24 }
 0x703   : > { %v6220_v10 = vadd.f32 %v6219_v14, %v6030_v9  ;;  %v4823_v20 = vpop.f32.mrb[11].mxu0  ;;  %v2771_v9 = vpop.permute.xlu1 %2770 }
 0x704   : > { %v6222_v21 = vadd.f32 %v6221_v37, %v4823_v20  ;;  %v7685_v23 = vpop.f32.mrb[26].mxu1  ;;  %v2766_v20 = vpop.permute.xlu0 %2765 }
 0x705   : > { %5021 = vst.msk [vmem:[%s7655_s18 + $0x38] sm:$0xff] %vm5013_vm7, %v6220_v10  ;;  %v7689_v38 = vpop.f32.mrb[27].mxu1  ;;  %v6247_v37 = vadd.f32 %v7685_v23, %v2741_v60 }
 0x706   : > { %5020 = vst.msk [vmem:[%s7655_s18 + $0x30] sm:$0xff] %vm5013_vm7, %v6222_v21  ;;  %v6033_v19 = vpop.f32.mrb[12].mxu0  ;;  %v6249_v10 = vadd.f32 %v7689_v38, %v2736_v36 }
 0x707   : > { %v6224_v39 = vadd.f32 %v6223_v34, %v6033_v19  ;;  %v4835_v40 = vpop.f32.mrb[13].mxu0 }
 0x708   : > { %v6226_v54 = vadd.f32 %v6225_v2, %v4835_v40  ;;  %v7693_v55 = vpop.f32.mrb[28].mxu1 }
 0x709   : > { %5023 = vst.msk [vmem:[%s7655_s18 + $0x48] sm:$0xff] %vm5013_vm7, %v6224_v39  ;;  %v7698_v25 = vpop.f32.mrb[29].mxu1  ;;  %v6251_v19 = vadd.f32 %v7693_v55, %v2751_v62 }
 0x70a   : > { %5022 = vst.msk [vmem:[%s7655_s18 + $0x40] sm:$0xff] %vm5013_vm7, %v6226_v54  ;;  %v6036_v45 = vpop.f32.mrb[14].mxu0  ;;  %v6253_v24 = vadd.f32 %v7698_v25, %v2746_v5  ;;  %v2781_v54 = vpop.permute.xlu1 %2780 }
 0x70b   : > { %v6228_v16 = vadd.f32 %v6227_v7, %v6036_v45  ;;  %v4847_v42 = vpop.f32.mrb[15].mxu0  ;;  %v2776_v45 = vpop.permute.xlu0 %2775 }
 0x70c   : > { %v6230_v48 = vadd.f32 %v6229_v28, %v4847_v42  ;;  %v7704_v17 = vpop.f32.mrb[30].mxu1 }
 0x70d   : > { %5025 = vst.msk [vmem:[%s7655_s18 + $0x58] sm:$0xff] %vm5013_vm7, %v6228_v16  ;;  %v7710_v56 = vpop.f32.mrb[31].mxu1  ;;  %v6255_v16 = vadd.f32 %v7704_v17, %v2761_v15 }
 0x70e   : > { %5024 = vst.msk [vmem:[%s7655_s18 + $0x50] sm:$0xff] %vm5013_vm7, %v6230_v48  ;;  %v6039_v47 = vpop.f32.mrb[16].mxu0  ;;  %v6257_v42 = vadd.f32 %v7710_v56, %v2756_v59 }
 0x70f   : > { %v6232_v12 = vadd.f32 %v6231_v41, %v6039_v47  ;;  %v4859_v6 = vpop.f32.mrb[17].mxu0  ;;  %v2786_v56 = vpop.permute.xlu0 %2785 }
 0x710   : > { %v6234_v51 = vadd.f32 %v6233_v33, %v4859_v6  ;;  %v7716_v3 = vpop.f32.mrb[32].mxu1  ;;  %v2791_v33 = vpop.permute.xlu1 %2790 }
 0x711   : > { %5027 = vst.msk [vmem:[%s7655_s18 + $0x68] sm:$0xff] %vm5013_vm7, %v6232_v12  ;;  %v7722_v57 = vpop.f32.mrb[33].mxu1  ;;  %v6259_v41 = vadd.f32 %v7716_v3, %v2771_v9 }
 0x712   : > { %5026 = vst.msk [vmem:[%s7655_s18 + $0x60] sm:$0xff] %vm5013_vm7, %v6234_v51  ;;  %v6042_v1 = vpop.f32.mrb[18].mxu0  ;;  %v6261_v17 = vadd.f32 %v7722_v57, %v2766_v20 }
 0x713   : > { %v6236_v27 = vadd.f32 %v6235_v26, %v6042_v1  ;;  %v4871_v0 = vpop.f32.mrb[19].mxu0 }
 0x714   : > { %v6238_v44 = vadd.f32 %v6237_v29, %v4871_v0  ;;  %v7728_v61 = vpop.f32.mrb[34].mxu1  ;;  %v2801_v1 = vpop.permute.xlu1 %2800 }
 0x715   : > { %5029 = vst.msk [vmem:[%s7655_s18 + $0x78] sm:$0xff] %vm5013_vm7, %v6236_v27  ;;  %v7733_v30 = vpop.f32.mrb[35].mxu1  ;;  %v6263_v26 = vadd.f32 %v7728_v61, %v2781_v54  ;;  %v2796_v27 = vpop.permute.xlu0 %2795 }
 0x716   : > { %5028 = vst.msk [vmem:[%s7655_s18 + $0x70] sm:$0xff] %vm5013_vm7, %v6238_v44  ;;  %v6045_v13 = vpop.f32.mrb[20].mxu0  ;;  %v6265_v3 = vadd.f32 %v7733_v30, %v2776_v45 }
 0x717   : > { %v6240_v35 = vadd.f32 %v6239_v4, %v6045_v13  ;;  %v4883_v32 = vpop.f32.mrb[21].mxu0 }
 0x718   : > { %v6242_v8 = vadd.f32 %v6241_v58, %v4883_v32  ;;  %v7738_v53 = vpop.f32.mrb[36].mxu1 }
 0x719   : > { %5031 = vst.msk [vmem:[%s7655_s18 + $0x88] sm:$0xff] %vm5013_vm7, %v6240_v35  ;;  %v7743_v63 = vpop.f32.mrb[37].mxu1  ;;  %v6267_v0 = vadd.f32 %v7738_v53, %v2791_v33  ;;  %v2811_v35 = vpop.permute.xlu1 %2810 }
 0x71a   : > { %5030 = vst.msk [vmem:[%s7655_s18 + $0x80] sm:$0xff] %vm5013_vm7, %v6242_v8  ;;  %v6048_v18 = vpop.f32.mrb[22].mxu0  ;;  %v6269_v44 = vadd.f32 %v7743_v63, %v2786_v56  ;;  %v2806_v8 = vpop.permute.xlu0 %2805 }
 0x71b   : > { %v6244_v31 = vadd.f32 %v6243_v22, %v6048_v18  ;;  %v4895_v43 = vpop.f32.mrb[23].mxu0 }
 0x71c   : > { %v6246_v50 = vadd.f32 %v6245_v49, %v4895_v43  ;;  %v5874_v14 = vpop.f32.mrb[38].mxu1 }
 0x71d   : > { %5033 = vst.msk [vmem:[%s7655_s18 + $0x98] sm:$0xff] %vm5013_vm7, %v6244_v31  ;;  %v3999_v11 = vpop.f32.mrb[39].mxu1  ;;  %v6271_v13 = vadd.f32 %v5874_v14, %v2801_v1 }
 0x71e   : > { %5032 = vst.msk [vmem:[%s7655_s18 + $0x90] sm:$0xff] %vm5013_vm7, %v6246_v50  ;;  %v6051_v46 = vpop.f32.mrb[24].mxu0  ;;  %v6273_v32 = vadd.f32 %v3999_v11, %v2796_v27  ;;  %v2821_v50 = vpop.permute.xlu1 %2820 }
 0x71f   : > { %v6248_v21 = vadd.f32 %v6247_v37, %v6051_v46  ;;  %v4907_v34 = vpop.f32.mrb[25].mxu0  ;;  %v2816_v37 = vpop.permute.xlu0 %2815 }
 0x720   : > { %v6250_v52 = vadd.f32 %v6249_v10, %v4907_v34  ;;  %v5877_v2 = vpop.f32.mrb[40].mxu1 }
 0x721   : > { %5035 = vst.msk [vmem:[%s7655_s18 + $0xa8] sm:$0xff] %vm5013_vm7, %v6248_v21  ;;  %v4013_v23 = vpop.f32.mrb[41].mxu1  ;;  %v6275_v63 = vadd.f32 %v5877_v2, %v2811_v35 }
 0x722   : > { %5034 = vst.msk [vmem:[%s7655_s18 + $0xa0] sm:$0xff] %vm5013_vm7, %v6250_v52  ;;  %v6054_v38 = vpop.f32.mrb[26].mxu0  ;;  %v6277_v49 = vadd.f32 %v4013_v23, %v2806_v8 }
 0x723   : > { %v6252_v39 = vadd.f32 %v6251_v19, %v6054_v38  ;;  %v4919_v40 = vpop.f32.mrb[27].mxu0 }
 0x724   : > { %v6254_v7 = vadd.f32 %v6253_v24, %v4919_v40  ;;  %v5880_v28 = vpop.f32.mrb[42].mxu1 }
 0x725   : > { %5037 = vst.msk [vmem:[%s7655_s18 + $0xb8] sm:$0xff] %vm5013_vm7, %v6252_v39  ;;  %v4027_v55 = vpop.f32.mrb[43].mxu1  ;;  %v6279_v11 = vadd.f32 %v5880_v28, %v2821_v50 }
 0x726   : > { %5036 = vst.msk [vmem:[%s7655_s18 + $0xb0] sm:$0xff] %vm5013_vm7, %v6254_v7  ;;  %v6057_v25 = vpop.f32.mrb[28].mxu0  ;;  %v6281_v9 = vadd.f32 %v4027_v55, %v2816_v37 }
 0x727   : > { %v6256_v60 = vadd.f32 %v6255_v16, %v6057_v25  ;;  %v4931_v48 = vpop.f32.mrb[29].mxu0 }
 0x728   : > { %v6258_v36 = vadd.f32 %v6257_v42, %v4931_v48 }
 0x729   : > { %5039 = vst.msk [vmem:[%s7655_s18 + $0xc8] sm:$0xff] %vm5013_vm7, %v6256_v60 }
 0x72a   : > { %5038 = vst.msk [vmem:[%s7655_s18 + $0xc0] sm:$0xff] %vm5013_vm7, %v6258_v36  ;;  %v6060_v47 = vpop.f32.mrb[30].mxu0 }
 0x72b   : > { %v6260_v12 = vadd.f32 %v6259_v41, %v6060_v47  ;;  %v4943_v6 = vpop.f32.mrb[31].mxu0 }
 0x72c   : > { %v6262_v51 = vadd.f32 %v6261_v17, %v4943_v6 }
 0x72d   : > { %5041 = vst.msk [vmem:[%s7655_s18 + $0xd8] sm:$0xff] %vm5013_vm7, %v6260_v12 }
 0x72e   : > { %5040 = vst.msk [vmem:[%s7655_s18 + $0xd0] sm:$0xff] %vm5013_vm7, %v6262_v51  ;;  %v6063_v62 = vpop.f32.mrb[32].mxu0 }
 0x72f   : > { %v6264_v57 = vadd.f32 %v6263_v26, %v6063_v62  ;;  %v4955_v29 = vpop.f32.mrb[33].mxu0 }
 0x730   : > { %v6266_v5 = vadd.f32 %v6265_v3, %v4955_v29 }
 0x731   : > { %5043 = vst.msk [vmem:[%s7655_s18 + $0xe8] sm:$0xff] %vm5013_vm7, %v6264_v57 }
 0x732   : > { %5042 = vst.msk [vmem:[%s7655_s18 + $0xe0] sm:$0xff] %vm5013_vm7, %v6266_v5  ;;  %v6066_v61 = vpop.f32.mrb[34].mxu0 }
 0x733   : > { %v6268_v4 = vadd.f32 %v6267_v0, %v6066_v61  ;;  %v4967_v30 = vpop.f32.mrb[35].mxu0 }
 0x734   : > { %v6270_v58 = vadd.f32 %v6269_v44, %v4967_v30 }
 0x735   : > { %5045 = vst.msk [vmem:[%s7655_s18 + $0xf8] sm:$0xff] %vm5013_vm7, %v6268_v4 }
 0x736   : > { %5044 = vst.msk [vmem:[%s7655_s18 + $0xf0] sm:$0xff] %vm5013_vm7, %v6270_v58  ;;  %v6069_v15 = vpop.f32.mrb[36].mxu0 }
 0x737   : > { %v6272_v53 = vadd.f32 %v6271_v13, %v6069_v15  ;;  %v4979_v59 = vpop.f32.mrb[37].mxu0 }
 0x738   : > { %v6274_v22 = vadd.f32 %v6273_v32, %v4979_v59 }
 0x739   : > { %5047 = vst.msk [vmem:[%s7655_s18 + $0x108] sm:$0xff] %vm5013_vm7, %v6272_v53 }
 0x73a   : > { %5046 = vst.msk [vmem:[%s7655_s18 + $0x100] sm:$0xff] %vm5013_vm7, %v6274_v22  ;;  %v6072_v18 = vpop.f32.mrb[38].mxu0 }
 0x73b   : > { %v6276_v31 = vadd.f32 %v6275_v63, %v6072_v18  ;;  %v4991_v43 = vpop.f32.mrb[39].mxu0 }
 0x73c   : > { %v6278_v14 = vadd.f32 %v6277_v49, %v4991_v43 }
 0x73d   : > { %5049 = vst.msk [vmem:[%s7655_s18 + $0x118] sm:$0xff] %vm5013_vm7, %v6276_v31 }
 0x73e   : > { %5048 = vst.msk [vmem:[%s7655_s18 + $0x110] sm:$0xff] %vm5013_vm7, %v6278_v14  ;;  %v6075_v10 = vpop.f32.mrb[40].mxu0 }
 0x73f   : > { %v6280_v46 = vadd.f32 %v6279_v11, %v6075_v10  ;;  %v5003_v20 = vpop.f32.mrb[41].mxu0 }
 0x740   : > { %v6282_v21 = vadd.f32 %v6281_v9, %v5003_v20 }
 0x741   : > { %5052 = vst.msk [vmem:[%s7655_s18 + $0x128] sm:$0xf] %vm5051_vm8, %v6280_v46 }
 0x742   : > { %5050 = vst.msk [vmem:[%s7655_s18 + $0x120] sm:$0xff] %vm5013_vm7, %v6282_v21 }
 0x743 PF: > { %s23_s25 = sadd.s32 1, %s6508_s25  }
 0x744   : > { %p20_p4 = scmp.ge.s32.totalorder %s23_s25, 4  }
 0x746   :  { %22 = sbr.rel (!%p20_p4) target bundleno = 1 (0x1), region = 102 }

</bundles_post_ra>
